<compile_context>
chip_gen: v7x
topology: tpu7x:2x2x1
jax: 0.10.0
libtpu: 0.0.40
codegen_flags: <defaults>
</compile_context>

<pallas_src>
import functools

import jax
import jax.numpy as jnp
from jax.experimental import pallas as pl
from jax.experimental.pallas import tpu as pltpu

NEG_FILL = -1e20
LN_EPS = 1e-5          # PyTorch nn.LayerNorm default eps


def _layernorm(v, g, b):
    mu = jnp.mean(v, axis=-1, keepdims=True)
    var = jnp.mean((v - mu) * (v - mu), axis=-1, keepdims=True)
    return (v - mu) * jax.lax.rsqrt(var + LN_EPS) * g + b


# ----------------------------------------------------------------------------
# Fully-fused Encoder kernel (one grid step per batch element)
# ----------------------------------------------------------------------------
def _encoder_fused_kernel(tok_ref, mask_ref, wemb_ref, pemb_ref,
                          fc_w_ref, fc_b_ref, n1_w_ref, n1_b_ref,
                          n2_w_ref, n2_b_ref, ff_w1_ref, ff_b1_ref,
                          ff_w2_ref, ff_b2_ref, o_ref, *, heads, scale):
    L = tok_ref.shape[1]
    V, E = wemb_ref.shape
    D = E // heads

    # ---- word + position embedding (one-hot gather on the MXU) ---------------
    tok = tok_ref[0]                                               # (L, 1) int32
    vocab_iota = jax.lax.broadcasted_iota(jnp.int32, (L, V), 1)    # (L, V)
    onehot = (vocab_iota == tok).astype(jnp.float32)               # (L, V)
    x = jnp.dot(onehot, wemb_ref[...].astype(jnp.float32),
                preferred_element_type=jnp.float32)                # (L, E)
    x = x + pemb_ref[0:L, :].astype(jnp.float32)                   # positions 0..L-1
    # (dropout after embedding = identity)

    m = mask_ref[0]                                                # (1, L) int32, 0 = masked
    fc_w = fc_w_ref[...].astype(jnp.float32)                       # (E, E) stored (in, out)

    # ---- multi-head self-attention, head-concat folded into fc_out -----------
    # q = k = v = x (the reference never applies the per-head Linears).
    attn = jnp.zeros((L, E), jnp.float32)
    for h in range(heads):                                         # static loop
        xh = x[:, h * D:(h + 1) * D]                               # (L, D)
        energy = jax.lax.dot_general(                              # q @ k^T, (L, L)
            xh, xh, (((1,), (1,)), ((), ())),
            preferred_element_type=jnp.float32)
        energy = jnp.where(m == 0, NEG_FILL, energy)               # masked_fill first
        logits = energy * scale                                    # / sqrt(embed_size)
        logits = logits - jnp.max(logits, axis=-1, keepdims=True)
        p = jnp.exp(logits)
        p = p * pl.reciprocal(jnp.sum(p, axis=-1, keepdims=True), approx=False)
        ctx = jnp.dot(p, xh, preferred_element_type=jnp.float32)   # (L, D)
        # concat-over-heads + fc_out == sum_h ctx_h @ fc_w[hD:(h+1)D, :]
        attn = attn + jnp.dot(ctx, fc_w[h * D:(h + 1) * D, :],
                              preferred_element_type=jnp.float32)
    attn = attn + fc_b_ref[...]

    # ---- residual + DOUBLE norm1 (dropout = identity) -------------------------
    y = attn + x
    y = _layernorm(y, n1_w_ref[...], n1_b_ref[...])
    y = _layernorm(y, n1_w_ref[...], n1_b_ref[...])

    # ---- feed-forward ----------------------------------------------------------
    hdn = jnp.dot(y, ff_w1_ref[...], preferred_element_type=jnp.float32) + ff_b1_ref[...]
    hdn = jnp.maximum(hdn, 0.0)
    f = jnp.dot(hdn, ff_w2_ref[...], preferred_element_type=jnp.float32) + ff_b2_ref[...]

    # ---- residual + norm2 ------------------------------------------------------
    o_ref[0] = _layernorm(f + y, n2_w_ref[...], n2_b_ref[...])


# ----------------------------------------------------------------------------
# Wrapper: whole Encoder forward = one pallas_call
# ----------------------------------------------------------------------------
def encoder_forward(params, tokens, mask, embed_size, heads):
    """tokens: (N, L) int32; mask: (N, 1, 1, L) PyTorch-style src mask -> (N, L, E)."""
    N, L = tokens.shape
    E = embed_size
    assert E % heads == 0
    assert mask.shape == (N, 1, 1, L), "expects PyTorch-convention (N,1,1,L) src mask"
    assert len(params["layers"]) == 1, "reference Encoder has exactly one TransformerBlock"
    lp = params["layers"][0]
    V, _ = params["word_emb"].shape
    P, _ = params["pos_emb"].shape
    assert L <= P
    H = lp["ff_w1"].shape[1]
    scale = 1.0 / (embed_size ** 0.5)            # reference uses sqrt(embed_size)

    tok3 = tokens.astype(jnp.int32)[:, :, None]             # (N, L, 1) -> (L,1) per step
    # 0/1 int mask (masked_fill only tests == 0, so this preserves semantics exactly)
    m = (mask != 0).astype(jnp.int32).reshape(N, 1, L)

    kern = functools.partial(_encoder_fused_kernel, heads=heads, scale=scale)
    return pl.pallas_call(
        kern,
        out_shape=jax.ShapeDtypeStruct((N, L, E), jnp.float32),
        grid=(N,),
        in_specs=[
            pl.BlockSpec((1, L, 1), lambda n: (n, 0, 0)),   # tokens
            pl.BlockSpec((1, 1, L), lambda n: (n, 0, 0)),   # mask
            pl.BlockSpec((V, E), lambda n: (0, 0)),         # word embedding table
            pl.BlockSpec((P, E), lambda n: (0, 0)),         # position embedding table
            pl.BlockSpec((E, E), lambda n: (0, 0)),         # fc_out W
            pl.BlockSpec((1, E), lambda n: (0, 0)),         # fc_out b
            pl.BlockSpec((1, E), lambda n: (0, 0)),         # norm1 gamma
            pl.BlockSpec((1, E), lambda n: (0, 0)),         # norm1 beta
            pl.BlockSpec((1, E), lambda n: (0, 0)),         # norm2 gamma
            pl.BlockSpec((1, E), lambda n: (0, 0)),         # norm2 beta
            pl.BlockSpec((E, H), lambda n: (0, 0)),         # ffn W1
            pl.BlockSpec((1, H), lambda n: (0, 0)),         # ffn b1
            pl.BlockSpec((H, E), lambda n: (0, 0)),         # ffn W2
            pl.BlockSpec((1, E), lambda n: (0, 0)),         # ffn b2
        ],
        out_specs=pl.BlockSpec((1, L, E), lambda n: (n, 0, 0)),
        compiler_params=pltpu.CompilerParams(
            dimension_semantics=("parallel",)),             # megacore on v7x
    )(tok3, m, params["word_emb"], params["pos_emb"],
      lp["fc_w"], lp["fc_b"], lp["n1_w"], lp["n1_b"], lp["n2_w"], lp["n2_b"],
      lp["ff_w1"], lp["ff_b1"], lp["ff_w2"], lp["ff_b2"])


# ----------------------------------------------------------------------------
# Pure-JAX reference (same quirky semantics) for a correctness sanity check
# ----------------------------------------------------------------------------
def encoder_reference(params, tokens, mask, embed_size, heads):
    with jax.default_matmul_precision("highest"):
        N, L = tokens.shape
        E = embed_size
        D = E // heads
        lp = params["layers"][0]
        x = (params["word_emb"][tokens]
             + params["pos_emb"][jnp.arange(L)][None, :, :]).astype(jnp.float32)
        q = x.reshape(N, L, heads, D)
        energy = jnp.einsum('nqhd,nkhd->nhqk', q, q)
        energy = jnp.where(mask.reshape(N, 1, 1, L) == 0, NEG_FILL, energy)
        attn = jax.nn.softmax(energy / (embed_size ** 0.5), axis=3)
        out = jnp.einsum('nhql,nlhd->nqhd', attn, q).reshape(N, L, E)
        out = jnp.dot(out, lp["fc_w"]) + lp["fc_b"]

        def ln(v, g, b):
            mu = v.mean(-1, keepdims=True)
            var = ((v - mu) ** 2).mean(-1, keepdims=True)
            return (v - mu) * jax.lax.rsqrt(var + LN_EPS) * g + b

        y = ln(ln(out + x, lp["n1_w"], lp["n1_b"]), lp["n1_w"], lp["n1_b"])
        h = jnp.maximum(jnp.dot(y, lp["ff_w1"]) + lp["ff_b1"], 0.0)
        f = jnp.dot(h, lp["ff_w2"]) + lp["ff_b2"]
        return ln(f + y, lp["n2_w"], lp["n2_b"])


# ----------------------------------------------------------------------------
# Deterministic parameter construction
# ----------------------------------------------------------------------------
def _init(key, shape, scale=0.02):
    return scale * jax.random.normal(key, shape, dtype=jnp.float32)


def make_params(key, embed_size, heads, src_vocab_size, max_length,
                forward_expansion, num_layers=1):
    hid = forward_expansion * embed_size
    keys = jax.random.split(key, 2 + num_layers)
    params = {
        "word_emb": _init(keys[0], (src_vocab_size, embed_size), 1.0),
        "pos_emb": _init(keys[1], (max_length, embed_size), 1.0),
        "layers": [],
    }
    for li in range(num_layers):
        lk = jax.random.split(keys[2 + li], 3)
        params["layers"].append({
            "fc_w": _init(lk[0], (embed_size, embed_size)),
            "fc_b": jnp.zeros((1, embed_size), jnp.float32),
            "n1_w": jnp.ones((1, embed_size), jnp.float32),
            "n1_b": jnp.zeros((1, embed_size), jnp.float32),
            "n2_w": jnp.ones((1, embed_size), jnp.float32),
            "n2_b": jnp.zeros((1, embed_size), jnp.float32),
            "ff_w1": _init(lk[1], (embed_size, hid)),
            "ff_b1": jnp.zeros((1, hid), jnp.float32),
            "ff_w2": _init(lk[2], (hid, embed_size)),
            "ff_b2": jnp.zeros((1, embed_size), jnp.float32),
        })
    return params


# ----------------------------------------------------------------------------
if __name__ == "__main__":
    # small config consistent with the module
    N, L = 2, 8
    embed_size, heads = 32, 8          # head_dim = 4
    forward_expansion = 4              # ffn hidden = 128
    src_vocab_size = 16
    max_length = 16

    root = jax.random.PRNGKey(0)
    k_par, k_tok = jax.random.split(root, 2)

    params = make_params(k_par, embed_size, heads, src_vocab_size, max_length,
                         forward_expansion, num_layers=1)
    tokens = jax.random.randint(k_tok, (N, L), 0, src_vocab_size, dtype=jnp.int32)

    # PyTorch-convention src mask (N,1,1,L): ones, with the last two key positions
    # of batch 1 padded out so the masked_fill path is exercised.
    mask = jnp.ones((N, 1, 1, L), jnp.float32).at[1, 0, 0, L - 2:].set(0.0)

    out = encoder_forward(params, tokens, mask, embed_size, heads)
    out = jax.block_until_ready(out)
    assert out.shape == (N, L, embed_size)

    ref = encoder_reference(params, tokens, mask, embed_size, heads)
    max_diff = float(jnp.max(jnp.abs(out - ref)))
    assert jnp.allclose(out, ref, atol=2e-2, rtol=2e-2), max_diff

    print("KERNEL_OK")
</pallas_src>

<mosaic_0001>
module attributes {stable_mosaic.version = 11 : i64} {
  func.func @_encoder_fused_kernel(%arg0: i32, %arg1: memref<1x8x1xi32, #tpu.memory_space<vmem>>, %arg2: memref<1x1x8xi32, #tpu.memory_space<vmem>>, %arg3: memref<16x32xf32, #tpu.memory_space<vmem>>, %arg4: memref<16x32xf32, #tpu.memory_space<vmem>>, %arg5: memref<32x32xf32, #tpu.memory_space<vmem>>, %arg6: memref<1x32xf32, #tpu.memory_space<vmem>>, %arg7: memref<1x32xf32, #tpu.memory_space<vmem>>, %arg8: memref<1x32xf32, #tpu.memory_space<vmem>>, %arg9: memref<1x32xf32, #tpu.memory_space<vmem>>, %arg10: memref<1x32xf32, #tpu.memory_space<vmem>>, %arg11: memref<32x128xf32, #tpu.memory_space<vmem>>, %arg12: memref<1x128xf32, #tpu.memory_space<vmem>>, %arg13: memref<128x32xf32, #tpu.memory_space<vmem>>, %arg14: memref<1x32xf32, #tpu.memory_space<vmem>>, %arg15: memref<1x8x32xf32, #tpu.memory_space<vmem>>) attributes {dimension_semantics = [#tpu.dimension_semantics<parallel>], iteration_bounds = array<i64: 2>, scalar_prefetch = 0 : i64, scratch_operands = 0 : i64, tpu.core_type = #tpu.core_type<tc>, window_params = [{transform_indices = @transform_0, window_bounds = array<i64: 1, 8, 1>}, {transform_indices = @transform_1, window_bounds = array<i64: 1, 1, 8>}, {pipeline_mode = #tpu.pipeline_mode<synchronous>, transform_indices = @transform_2, window_bounds = array<i64: 16, 32>}, {pipeline_mode = #tpu.pipeline_mode<synchronous>, transform_indices = @transform_3, window_bounds = array<i64: 16, 32>}, {pipeline_mode = #tpu.pipeline_mode<synchronous>, transform_indices = @transform_4, window_bounds = array<i64: 32, 32>}, {pipeline_mode = #tpu.pipeline_mode<synchronous>, transform_indices = @transform_5, window_bounds = array<i64: 1, 32>}, {pipeline_mode = #tpu.pipeline_mode<synchronous>, transform_indices = @transform_6, window_bounds = array<i64: 1, 32>}, {pipeline_mode = #tpu.pipeline_mode<synchronous>, transform_indices = @transform_7, window_bounds = array<i64: 1, 32>}, {pipeline_mode = #tpu.pipeline_mode<synchronous>, transform_indices = @transform_8, window_bounds = array<i64: 1, 32>}, {pipeline_mode = #tpu.pipeline_mode<synchronous>, transform_indices = @transform_9, window_bounds = array<i64: 1, 32>}, {pipeline_mode = #tpu.pipeline_mode<synchronous>, transform_indices = @transform_10, window_bounds = array<i64: 32, 128>}, {pipeline_mode = #tpu.pipeline_mode<synchronous>, transform_indices = @transform_11, window_bounds = array<i64: 1, 128>}, {pipeline_mode = #tpu.pipeline_mode<synchronous>, transform_indices = @transform_12, window_bounds = array<i64: 128, 32>}, {pipeline_mode = #tpu.pipeline_mode<synchronous>, transform_indices = @transform_13, window_bounds = array<i64: 1, 32>}, {transform_indices = @transform_14, window_bounds = array<i64: 1, 8, 32>}]} {
    %c0 = arith.constant 0 : index
    %c0_0 = arith.constant 0 : index
    %c0_1 = arith.constant 0 : index
    %0 = vector.load %arg1[%c0, %c0_0, %c0_1] : memref<1x8x1xi32, #tpu.memory_space<vmem>>, vector<1x8x1xi32>
    %1 = vector.shape_cast %0 : vector<1x8x1xi32> to vector<8x1xi32>
    %2 = tpu.iota {dimensions = array<i32: 1>} : vector<8x16xi32>
    %3 = vector.broadcast %1 : vector<8x1xi32> to vector<8x16xi32>
    %4 = arith.cmpi eq, %2, %3 : vector<8x16xi32>
    %5 = arith.extui %4 : vector<8x16xi1> to vector<8x16xi32>
    %6 = arith.sitofp %5 : vector<8x16xi32> to vector<8x16xf32>
    %c0_2 = arith.constant 0 : index
    %c0_3 = arith.constant 0 : index
    %7 = vector.load %arg3[%c0_2, %c0_3] : memref<16x32xf32, #tpu.memory_space<vmem>>, vector<16x32xf32>
    %cst = arith.constant dense<0.000000e+00> : vector<8x32xf32>
    %8 = tpu.matmul %6, %7, %cst {dimension_numbers = #tpu.dot_dimension_numbers<[1], [0], [0], [1], [0, 0, 1, 1], [], []>} : vector<8x16xf32>, vector<16x32xf32>, vector<8x32xf32> -> vector<8x32xf32>
    %c0_4 = arith.constant 0 : index
    %c0_5 = arith.constant 0 : index
    %9 = vector.load %arg4[%c0_4, %c0_5] : memref<16x32xf32, #tpu.memory_space<vmem>>, vector<8x32xf32>
    %10 = arith.addf %8, %9 : vector<8x32xf32>
    %c0_6 = arith.constant 0 : index
    %c0_7 = arith.constant 0 : index
    %c0_8 = arith.constant 0 : index
    %11 = vector.load %arg2[%c0_6, %c0_7, %c0_8] : memref<1x1x8xi32, #tpu.memory_space<vmem>>, vector<1x1x8xi32>
    %12 = vector.shape_cast %11 : vector<1x1x8xi32> to vector<1x8xi32>
    %c0_9 = arith.constant 0 : index
    %c0_10 = arith.constant 0 : index
    %13 = vector.load %arg5[%c0_9, %c0_10] : memref<32x32xf32, #tpu.memory_space<vmem>>, vector<32x32xf32>
    %cst_11 = arith.constant 0.000000e+00 : f32
    %14 = vector.broadcast %cst_11 : f32 to vector<8x32xf32>
    %15 = vector.extract_strided_slice %10 {offsets = [0, 0], sizes = [8, 4], strides = [1, 1]} : vector<8x32xf32> to vector<8x4xf32>
    %cst_12 = arith.constant dense<0.000000e+00> : vector<8x8xf32>
    %16 = tpu.matmul %15, %15, %cst_12 {dimension_numbers = #tpu.dot_dimension_numbers<[1], [1], [0], [0], [0, 0, 1, 0], [], []>} : vector<8x4xf32>, vector<8x4xf32>, vector<8x8xf32> -> vector<8x8xf32>
    %c0_i32 = arith.constant 0 : i32
    %17 = vector.broadcast %c0_i32 : i32 to vector<1x8xi32>
    %18 = arith.cmpi eq, %12, %17 : vector<1x8xi32>
    %cst_13 = arith.constant -1.000000e+20 : f32
    %19 = vector.shape_cast %18 : vector<1x8xi1> to vector<1x8xi1>
    %20 = vector.broadcast %19 : vector<1x8xi1> to vector<8x8xi1>
    %21 = vector.broadcast %cst_13 : f32 to vector<8x8xf32>
    %22 = arith.select %20, %21, %16 : vector<8x8xi1>, vector<8x8xf32>
    %cst_14 = arith.constant 0.176776692 : f32
    %23 = vector.broadcast %cst_14 : f32 to vector<8x8xf32>
    %24 = arith.mulf %22, %23 : vector<8x8xf32>
    %cst_15 = arith.constant dense<0xFF800000> : vector<8xf32>
    %25 = vector.multi_reduction <maximumf>, %24, %cst_15 [1] : vector<8x8xf32> to vector<8xf32>
    %26 = vector.shape_cast %25 : vector<8xf32> to vector<8x1xf32>
    %27 = vector.broadcast %26 : vector<8x1xf32> to vector<8x8xf32>
    %28 = arith.subf %24, %27 : vector<8x8xf32>
    %29 = math.exp %28 : vector<8x8xf32>
    %cst_16 = arith.constant dense<0.000000e+00> : vector<8xf32>
    %30 = vector.multi_reduction <add>, %29, %cst_16 [1] : vector<8x8xf32> to vector<8xf32>
    %31 = vector.shape_cast %30 : vector<8xf32> to vector<8x1xf32>
    %32 = tpu.reciprocal %31 : vector<8x1xf32> -> vector<8x1xf32>
    %33 = vector.broadcast %32 : vector<8x1xf32> to vector<8x8xf32>
    %34 = arith.mulf %29, %33 : vector<8x8xf32>
    %cst_17 = arith.constant dense<0.000000e+00> : vector<8x4xf32>
    %35 = tpu.matmul %34, %15, %cst_17 {dimension_numbers = #tpu.dot_dimension_numbers<[1], [0], [0], [1], [0, 0, 1, 1], [], []>} : vector<8x8xf32>, vector<8x4xf32>, vector<8x4xf32> -> vector<8x4xf32>
    %36 = vector.extract_strided_slice %13 {offsets = [0, 0], sizes = [4, 32], strides = [1, 1]} : vector<32x32xf32> to vector<4x32xf32>
    %cst_18 = arith.constant dense<0.000000e+00> : vector<8x32xf32>
    %37 = tpu.matmul %35, %36, %cst_18 {dimension_numbers = #tpu.dot_dimension_numbers<[1], [0], [0], [1], [0, 0, 1, 1], [], []>} : vector<8x4xf32>, vector<4x32xf32>, vector<8x32xf32> -> vector<8x32xf32>
    %38 = arith.addf %14, %37 : vector<8x32xf32>
    %39 = vector.extract_strided_slice %10 {offsets = [0, 4], sizes = [8, 4], strides = [1, 1]} : vector<8x32xf32> to vector<8x4xf32>
    %cst_19 = arith.constant dense<0.000000e+00> : vector<8x8xf32>
    %40 = tpu.matmul %39, %39, %cst_19 {dimension_numbers = #tpu.dot_dimension_numbers<[1], [1], [0], [0], [0, 0, 1, 0], [], []>} : vector<8x4xf32>, vector<8x4xf32>, vector<8x8xf32> -> vector<8x8xf32>
    %c0_i32_20 = arith.constant 0 : i32
    %41 = vector.broadcast %c0_i32_20 : i32 to vector<1x8xi32>
    %42 = arith.cmpi eq, %12, %41 : vector<1x8xi32>
    %cst_21 = arith.constant -1.000000e+20 : f32
    %43 = vector.shape_cast %42 : vector<1x8xi1> to vector<1x8xi1>
    %44 = vector.broadcast %43 : vector<1x8xi1> to vector<8x8xi1>
    %45 = vector.broadcast %cst_21 : f32 to vector<8x8xf32>
    %46 = arith.select %44, %45, %40 : vector<8x8xi1>, vector<8x8xf32>
    %cst_22 = arith.constant 0.176776692 : f32
    %47 = vector.broadcast %cst_22 : f32 to vector<8x8xf32>
    %48 = arith.mulf %46, %47 : vector<8x8xf32>
    %cst_23 = arith.constant dense<0xFF800000> : vector<8xf32>
    %49 = vector.multi_reduction <maximumf>, %48, %cst_23 [1] : vector<8x8xf32> to vector<8xf32>
    %50 = vector.shape_cast %49 : vector<8xf32> to vector<8x1xf32>
    %51 = vector.broadcast %50 : vector<8x1xf32> to vector<8x8xf32>
    %52 = arith.subf %48, %51 : vector<8x8xf32>
    %53 = math.exp %52 : vector<8x8xf32>
    %cst_24 = arith.constant dense<0.000000e+00> : vector<8xf32>
    %54 = vector.multi_reduction <add>, %53, %cst_24 [1] : vector<8x8xf32> to vector<8xf32>
    %55 = vector.shape_cast %54 : vector<8xf32> to vector<8x1xf32>
    %56 = tpu.reciprocal %55 : vector<8x1xf32> -> vector<8x1xf32>
    %57 = vector.broadcast %56 : vector<8x1xf32> to vector<8x8xf32>
    %58 = arith.mulf %53, %57 : vector<8x8xf32>
    %cst_25 = arith.constant dense<0.000000e+00> : vector<8x4xf32>
    %59 = tpu.matmul %58, %39, %cst_25 {dimension_numbers = #tpu.dot_dimension_numbers<[1], [0], [0], [1], [0, 0, 1, 1], [], []>} : vector<8x8xf32>, vector<8x4xf32>, vector<8x4xf32> -> vector<8x4xf32>
    %60 = vector.extract_strided_slice %13 {offsets = [4, 0], sizes = [4, 32], strides = [1, 1]} : vector<32x32xf32> to vector<4x32xf32>
    %cst_26 = arith.constant dense<0.000000e+00> : vector<8x32xf32>
    %61 = tpu.matmul %59, %60, %cst_26 {dimension_numbers = #tpu.dot_dimension_numbers<[1], [0], [0], [1], [0, 0, 1, 1], [], []>} : vector<8x4xf32>, vector<4x32xf32>, vector<8x32xf32> -> vector<8x32xf32>
    %62 = arith.addf %38, %61 : vector<8x32xf32>
    %63 = vector.extract_strided_slice %10 {offsets = [0, 8], sizes = [8, 4], strides = [1, 1]} : vector<8x32xf32> to vector<8x4xf32>
    %cst_27 = arith.constant dense<0.000000e+00> : vector<8x8xf32>
    %64 = tpu.matmul %63, %63, %cst_27 {dimension_numbers = #tpu.dot_dimension_numbers<[1], [1], [0], [0], [0, 0, 1, 0], [], []>} : vector<8x4xf32>, vector<8x4xf32>, vector<8x8xf32> -> vector<8x8xf32>
    %c0_i32_28 = arith.constant 0 : i32
    %65 = vector.broadcast %c0_i32_28 : i32 to vector<1x8xi32>
    %66 = arith.cmpi eq, %12, %65 : vector<1x8xi32>
    %cst_29 = arith.constant -1.000000e+20 : f32
    %67 = vector.shape_cast %66 : vector<1x8xi1> to vector<1x8xi1>
    %68 = vector.broadcast %67 : vector<1x8xi1> to vector<8x8xi1>
    %69 = vector.broadcast %cst_29 : f32 to vector<8x8xf32>
    %70 = arith.select %68, %69, %64 : vector<8x8xi1>, vector<8x8xf32>
    %cst_30 = arith.constant 0.176776692 : f32
    %71 = vector.broadcast %cst_30 : f32 to vector<8x8xf32>
    %72 = arith.mulf %70, %71 : vector<8x8xf32>
    %cst_31 = arith.constant dense<0xFF800000> : vector<8xf32>
    %73 = vector.multi_reduction <maximumf>, %72, %cst_31 [1] : vector<8x8xf32> to vector<8xf32>
    %74 = vector.shape_cast %73 : vector<8xf32> to vector<8x1xf32>
    %75 = vector.broadcast %74 : vector<8x1xf32> to vector<8x8xf32>
    %76 = arith.subf %72, %75 : vector<8x8xf32>
    %77 = math.exp %76 : vector<8x8xf32>
    %cst_32 = arith.constant dense<0.000000e+00> : vector<8xf32>
    %78 = vector.multi_reduction <add>, %77, %cst_32 [1] : vector<8x8xf32> to vector<8xf32>
    %79 = vector.shape_cast %78 : vector<8xf32> to vector<8x1xf32>
    %80 = tpu.reciprocal %79 : vector<8x1xf32> -> vector<8x1xf32>
    %81 = vector.broadcast %80 : vector<8x1xf32> to vector<8x8xf32>
    %82 = arith.mulf %77, %81 : vector<8x8xf32>
    %cst_33 = arith.constant dense<0.000000e+00> : vector<8x4xf32>
    %83 = tpu.matmul %82, %63, %cst_33 {dimension_numbers = #tpu.dot_dimension_numbers<[1], [0], [0], [1], [0, 0, 1, 1], [], []>} : vector<8x8xf32>, vector<8x4xf32>, vector<8x4xf32> -> vector<8x4xf32>
    %84 = vector.extract_strided_slice %13 {offsets = [8, 0], sizes = [4, 32], strides = [1, 1]} : vector<32x32xf32> to vector<4x32xf32>
    %cst_34 = arith.constant dense<0.000000e+00> : vector<8x32xf32>
    %85 = tpu.matmul %83, %84, %cst_34 {dimension_numbers = #tpu.dot_dimension_numbers<[1], [0], [0], [1], [0, 0, 1, 1], [], []>} : vector<8x4xf32>, vector<4x32xf32>, vector<8x32xf32> -> vector<8x32xf32>
    %86 = arith.addf %62, %85 : vector<8x32xf32>
    %87 = vector.extract_strided_slice %10 {offsets = [0, 12], sizes = [8, 4], strides = [1, 1]} : vector<8x32xf32> to vector<8x4xf32>
    %cst_35 = arith.constant dense<0.000000e+00> : vector<8x8xf32>
    %88 = tpu.matmul %87, %87, %cst_35 {dimension_numbers = #tpu.dot_dimension_numbers<[1], [1], [0], [0], [0, 0, 1, 0], [], []>} : vector<8x4xf32>, vector<8x4xf32>, vector<8x8xf32> -> vector<8x8xf32>
    %c0_i32_36 = arith.constant 0 : i32
    %89 = vector.broadcast %c0_i32_36 : i32 to vector<1x8xi32>
    %90 = arith.cmpi eq, %12, %89 : vector<1x8xi32>
    %cst_37 = arith.constant -1.000000e+20 : f32
    %91 = vector.shape_cast %90 : vector<1x8xi1> to vector<1x8xi1>
    %92 = vector.broadcast %91 : vector<1x8xi1> to vector<8x8xi1>
    %93 = vector.broadcast %cst_37 : f32 to vector<8x8xf32>
    %94 = arith.select %92, %93, %88 : vector<8x8xi1>, vector<8x8xf32>
    %cst_38 = arith.constant 0.176776692 : f32
    %95 = vector.broadcast %cst_38 : f32 to vector<8x8xf32>
    %96 = arith.mulf %94, %95 : vector<8x8xf32>
    %cst_39 = arith.constant dense<0xFF800000> : vector<8xf32>
    %97 = vector.multi_reduction <maximumf>, %96, %cst_39 [1] : vector<8x8xf32> to vector<8xf32>
    %98 = vector.shape_cast %97 : vector<8xf32> to vector<8x1xf32>
    %99 = vector.broadcast %98 : vector<8x1xf32> to vector<8x8xf32>
    %100 = arith.subf %96, %99 : vector<8x8xf32>
    %101 = math.exp %100 : vector<8x8xf32>
    %cst_40 = arith.constant dense<0.000000e+00> : vector<8xf32>
    %102 = vector.multi_reduction <add>, %101, %cst_40 [1] : vector<8x8xf32> to vector<8xf32>
    %103 = vector.shape_cast %102 : vector<8xf32> to vector<8x1xf32>
    %104 = tpu.reciprocal %103 : vector<8x1xf32> -> vector<8x1xf32>
    %105 = vector.broadcast %104 : vector<8x1xf32> to vector<8x8xf32>
    %106 = arith.mulf %101, %105 : vector<8x8xf32>
    %cst_41 = arith.constant dense<0.000000e+00> : vector<8x4xf32>
    %107 = tpu.matmul %106, %87, %cst_41 {dimension_numbers = #tpu.dot_dimension_numbers<[1], [0], [0], [1], [0, 0, 1, 1], [], []>} : vector<8x8xf32>, vector<8x4xf32>, vector<8x4xf32> -> vector<8x4xf32>
    %108 = vector.extract_strided_slice %13 {offsets = [12, 0], sizes = [4, 32], strides = [1, 1]} : vector<32x32xf32> to vector<4x32xf32>
    %cst_42 = arith.constant dense<0.000000e+00> : vector<8x32xf32>
    %109 = tpu.matmul %107, %108, %cst_42 {dimension_numbers = #tpu.dot_dimension_numbers<[1], [0], [0], [1], [0, 0, 1, 1], [], []>} : vector<8x4xf32>, vector<4x32xf32>, vector<8x32xf32> -> vector<8x32xf32>
    %110 = arith.addf %86, %109 : vector<8x32xf32>
    %111 = vector.extract_strided_slice %10 {offsets = [0, 16], sizes = [8, 4], strides = [1, 1]} : vector<8x32xf32> to vector<8x4xf32>
    %cst_43 = arith.constant dense<0.000000e+00> : vector<8x8xf32>
    %112 = tpu.matmul %111, %111, %cst_43 {dimension_numbers = #tpu.dot_dimension_numbers<[1], [1], [0], [0], [0, 0, 1, 0], [], []>} : vector<8x4xf32>, vector<8x4xf32>, vector<8x8xf32> -> vector<8x8xf32>
    %c0_i32_44 = arith.constant 0 : i32
    %113 = vector.broadcast %c0_i32_44 : i32 to vector<1x8xi32>
    %114 = arith.cmpi eq, %12, %113 : vector<1x8xi32>
    %cst_45 = arith.constant -1.000000e+20 : f32
    %115 = vector.shape_cast %114 : vector<1x8xi1> to vector<1x8xi1>
    %116 = vector.broadcast %115 : vector<1x8xi1> to vector<8x8xi1>
    %117 = vector.broadcast %cst_45 : f32 to vector<8x8xf32>
    %118 = arith.select %116, %117, %112 : vector<8x8xi1>, vector<8x8xf32>
    %cst_46 = arith.constant 0.176776692 : f32
    %119 = vector.broadcast %cst_46 : f32 to vector<8x8xf32>
    %120 = arith.mulf %118, %119 : vector<8x8xf32>
    %cst_47 = arith.constant dense<0xFF800000> : vector<8xf32>
    %121 = vector.multi_reduction <maximumf>, %120, %cst_47 [1] : vector<8x8xf32> to vector<8xf32>
    %122 = vector.shape_cast %121 : vector<8xf32> to vector<8x1xf32>
    %123 = vector.broadcast %122 : vector<8x1xf32> to vector<8x8xf32>
    %124 = arith.subf %120, %123 : vector<8x8xf32>
    %125 = math.exp %124 : vector<8x8xf32>
    %cst_48 = arith.constant dense<0.000000e+00> : vector<8xf32>
    %126 = vector.multi_reduction <add>, %125, %cst_48 [1] : vector<8x8xf32> to vector<8xf32>
    %127 = vector.shape_cast %126 : vector<8xf32> to vector<8x1xf32>
    %128 = tpu.reciprocal %127 : vector<8x1xf32> -> vector<8x1xf32>
    %129 = vector.broadcast %128 : vector<8x1xf32> to vector<8x8xf32>
    %130 = arith.mulf %125, %129 : vector<8x8xf32>
    %cst_49 = arith.constant dense<0.000000e+00> : vector<8x4xf32>
    %131 = tpu.matmul %130, %111, %cst_49 {dimension_numbers = #tpu.dot_dimension_numbers<[1], [0], [0], [1], [0, 0, 1, 1], [], []>} : vector<8x8xf32>, vector<8x4xf32>, vector<8x4xf32> -> vector<8x4xf32>
    %132 = vector.extract_strided_slice %13 {offsets = [16, 0], sizes = [4, 32], strides = [1, 1]} : vector<32x32xf32> to vector<4x32xf32>
    %cst_50 = arith.constant dense<0.000000e+00> : vector<8x32xf32>
    %133 = tpu.matmul %131, %132, %cst_50 {dimension_numbers = #tpu.dot_dimension_numbers<[1], [0], [0], [1], [0, 0, 1, 1], [], []>} : vector<8x4xf32>, vector<4x32xf32>, vector<8x32xf32> -> vector<8x32xf32>
    %134 = arith.addf %110, %133 : vector<8x32xf32>
    %135 = vector.extract_strided_slice %10 {offsets = [0, 20], sizes = [8, 4], strides = [1, 1]} : vector<8x32xf32> to vector<8x4xf32>
    %cst_51 = arith.constant dense<0.000000e+00> : vector<8x8xf32>
    %136 = tpu.matmul %135, %135, %cst_51 {dimension_numbers = #tpu.dot_dimension_numbers<[1], [1], [0], [0], [0, 0, 1, 0], [], []>} : vector<8x4xf32>, vector<8x4xf32>, vector<8x8xf32> -> vector<8x8xf32>
    %c0_i32_52 = arith.constant 0 : i32
    %137 = vector.broadcast %c0_i32_52 : i32 to vector<1x8xi32>
    %138 = arith.cmpi eq, %12, %137 : vector<1x8xi32>
    %cst_53 = arith.constant -1.000000e+20 : f32
    %139 = vector.shape_cast %138 : vector<1x8xi1> to vector<1x8xi1>
    %140 = vector.broadcast %139 : vector<1x8xi1> to vector<8x8xi1>
    %141 = vector.broadcast %cst_53 : f32 to vector<8x8xf32>
    %142 = arith.select %140, %141, %136 : vector<8x8xi1>, vector<8x8xf32>
    %cst_54 = arith.constant 0.176776692 : f32
    %143 = vector.broadcast %cst_54 : f32 to vector<8x8xf32>
    %144 = arith.mulf %142, %143 : vector<8x8xf32>
    %cst_55 = arith.constant dense<0xFF800000> : vector<8xf32>
    %145 = vector.multi_reduction <maximumf>, %144, %cst_55 [1] : vector<8x8xf32> to vector<8xf32>
    %146 = vector.shape_cast %145 : vector<8xf32> to vector<8x1xf32>
    %147 = vector.broadcast %146 : vector<8x1xf32> to vector<8x8xf32>
    %148 = arith.subf %144, %147 : vector<8x8xf32>
    %149 = math.exp %148 : vector<8x8xf32>
    %cst_56 = arith.constant dense<0.000000e+00> : vector<8xf32>
    %150 = vector.multi_reduction <add>, %149, %cst_56 [1] : vector<8x8xf32> to vector<8xf32>
    %151 = vector.shape_cast %150 : vector<8xf32> to vector<8x1xf32>
    %152 = tpu.reciprocal %151 : vector<8x1xf32> -> vector<8x1xf32>
    %153 = vector.broadcast %152 : vector<8x1xf32> to vector<8x8xf32>
    %154 = arith.mulf %149, %153 : vector<8x8xf32>
    %cst_57 = arith.constant dense<0.000000e+00> : vector<8x4xf32>
    %155 = tpu.matmul %154, %135, %cst_57 {dimension_numbers = #tpu.dot_dimension_numbers<[1], [0], [0], [1], [0, 0, 1, 1], [], []>} : vector<8x8xf32>, vector<8x4xf32>, vector<8x4xf32> -> vector<8x4xf32>
    %156 = vector.extract_strided_slice %13 {offsets = [20, 0], sizes = [4, 32], strides = [1, 1]} : vector<32x32xf32> to vector<4x32xf32>
    %cst_58 = arith.constant dense<0.000000e+00> : vector<8x32xf32>
    %157 = tpu.matmul %155, %156, %cst_58 {dimension_numbers = #tpu.dot_dimension_numbers<[1], [0], [0], [1], [0, 0, 1, 1], [], []>} : vector<8x4xf32>, vector<4x32xf32>, vector<8x32xf32> -> vector<8x32xf32>
    %158 = arith.addf %134, %157 : vector<8x32xf32>
    %159 = vector.extract_strided_slice %10 {offsets = [0, 24], sizes = [8, 4], strides = [1, 1]} : vector<8x32xf32> to vector<8x4xf32>
    %cst_59 = arith.constant dense<0.000000e+00> : vector<8x8xf32>
    %160 = tpu.matmul %159, %159, %cst_59 {dimension_numbers = #tpu.dot_dimension_numbers<[1], [1], [0], [0], [0, 0, 1, 0], [], []>} : vector<8x4xf32>, vector<8x4xf32>, vector<8x8xf32> -> vector<8x8xf32>
    %c0_i32_60 = arith.constant 0 : i32
    %161 = vector.broadcast %c0_i32_60 : i32 to vector<1x8xi32>
    %162 = arith.cmpi eq, %12, %161 : vector<1x8xi32>
    %cst_61 = arith.constant -1.000000e+20 : f32
    %163 = vector.shape_cast %162 : vector<1x8xi1> to vector<1x8xi1>
    %164 = vector.broadcast %163 : vector<1x8xi1> to vector<8x8xi1>
    %165 = vector.broadcast %cst_61 : f32 to vector<8x8xf32>
    %166 = arith.select %164, %165, %160 : vector<8x8xi1>, vector<8x8xf32>
    %cst_62 = arith.constant 0.176776692 : f32
    %167 = vector.broadcast %cst_62 : f32 to vector<8x8xf32>
    %168 = arith.mulf %166, %167 : vector<8x8xf32>
    %cst_63 = arith.constant dense<0xFF800000> : vector<8xf32>
    %169 = vector.multi_reduction <maximumf>, %168, %cst_63 [1] : vector<8x8xf32> to vector<8xf32>
    %170 = vector.shape_cast %169 : vector<8xf32> to vector<8x1xf32>
    %171 = vector.broadcast %170 : vector<8x1xf32> to vector<8x8xf32>
    %172 = arith.subf %168, %171 : vector<8x8xf32>
    %173 = math.exp %172 : vector<8x8xf32>
    %cst_64 = arith.constant dense<0.000000e+00> : vector<8xf32>
    %174 = vector.multi_reduction <add>, %173, %cst_64 [1] : vector<8x8xf32> to vector<8xf32>
    %175 = vector.shape_cast %174 : vector<8xf32> to vector<8x1xf32>
    %176 = tpu.reciprocal %175 : vector<8x1xf32> -> vector<8x1xf32>
    %177 = vector.broadcast %176 : vector<8x1xf32> to vector<8x8xf32>
    %178 = arith.mulf %173, %177 : vector<8x8xf32>
    %cst_65 = arith.constant dense<0.000000e+00> : vector<8x4xf32>
    %179 = tpu.matmul %178, %159, %cst_65 {dimension_numbers = #tpu.dot_dimension_numbers<[1], [0], [0], [1], [0, 0, 1, 1], [], []>} : vector<8x8xf32>, vector<8x4xf32>, vector<8x4xf32> -> vector<8x4xf32>
    %180 = vector.extract_strided_slice %13 {offsets = [24, 0], sizes = [4, 32], strides = [1, 1]} : vector<32x32xf32> to vector<4x32xf32>
    %cst_66 = arith.constant dense<0.000000e+00> : vector<8x32xf32>
    %181 = tpu.matmul %179, %180, %cst_66 {dimension_numbers = #tpu.dot_dimension_numbers<[1], [0], [0], [1], [0, 0, 1, 1], [], []>} : vector<8x4xf32>, vector<4x32xf32>, vector<8x32xf32> -> vector<8x32xf32>
    %182 = arith.addf %158, %181 : vector<8x32xf32>
    %183 = vector.extract_strided_slice %10 {offsets = [0, 28], sizes = [8, 4], strides = [1, 1]} : vector<8x32xf32> to vector<8x4xf32>
    %cst_67 = arith.constant dense<0.000000e+00> : vector<8x8xf32>
    %184 = tpu.matmul %183, %183, %cst_67 {dimension_numbers = #tpu.dot_dimension_numbers<[1], [1], [0], [0], [0, 0, 1, 0], [], []>} : vector<8x4xf32>, vector<8x4xf32>, vector<8x8xf32> -> vector<8x8xf32>
    %c0_i32_68 = arith.constant 0 : i32
    %185 = vector.broadcast %c0_i32_68 : i32 to vector<1x8xi32>
    %186 = arith.cmpi eq, %12, %185 : vector<1x8xi32>
    %cst_69 = arith.constant -1.000000e+20 : f32
    %187 = vector.shape_cast %186 : vector<1x8xi1> to vector<1x8xi1>
    %188 = vector.broadcast %187 : vector<1x8xi1> to vector<8x8xi1>
    %189 = vector.broadcast %cst_69 : f32 to vector<8x8xf32>
    %190 = arith.select %188, %189, %184 : vector<8x8xi1>, vector<8x8xf32>
    %cst_70 = arith.constant 0.176776692 : f32
    %191 = vector.broadcast %cst_70 : f32 to vector<8x8xf32>
    %192 = arith.mulf %190, %191 : vector<8x8xf32>
    %cst_71 = arith.constant dense<0xFF800000> : vector<8xf32>
    %193 = vector.multi_reduction <maximumf>, %192, %cst_71 [1] : vector<8x8xf32> to vector<8xf32>
    %194 = vector.shape_cast %193 : vector<8xf32> to vector<8x1xf32>
    %195 = vector.broadcast %194 : vector<8x1xf32> to vector<8x8xf32>
    %196 = arith.subf %192, %195 : vector<8x8xf32>
    %197 = math.exp %196 : vector<8x8xf32>
    %cst_72 = arith.constant dense<0.000000e+00> : vector<8xf32>
    %198 = vector.multi_reduction <add>, %197, %cst_72 [1] : vector<8x8xf32> to vector<8xf32>
    %199 = vector.shape_cast %198 : vector<8xf32> to vector<8x1xf32>
    %200 = tpu.reciprocal %199 : vector<8x1xf32> -> vector<8x1xf32>
    %201 = vector.broadcast %200 : vector<8x1xf32> to vector<8x8xf32>
    %202 = arith.mulf %197, %201 : vector<8x8xf32>
    %cst_73 = arith.constant dense<0.000000e+00> : vector<8x4xf32>
    %203 = tpu.matmul %202, %183, %cst_73 {dimension_numbers = #tpu.dot_dimension_numbers<[1], [0], [0], [1], [0, 0, 1, 1], [], []>} : vector<8x8xf32>, vector<8x4xf32>, vector<8x4xf32> -> vector<8x4xf32>
    %204 = vector.extract_strided_slice %13 {offsets = [28, 0], sizes = [4, 32], strides = [1, 1]} : vector<32x32xf32> to vector<4x32xf32>
    %cst_74 = arith.constant dense<0.000000e+00> : vector<8x32xf32>
    %205 = tpu.matmul %203, %204, %cst_74 {dimension_numbers = #tpu.dot_dimension_numbers<[1], [0], [0], [1], [0, 0, 1, 1], [], []>} : vector<8x4xf32>, vector<4x32xf32>, vector<8x32xf32> -> vector<8x32xf32>
    %206 = arith.addf %182, %205 : vector<8x32xf32>
    %c0_75 = arith.constant 0 : index
    %c0_76 = arith.constant 0 : index
    %207 = vector.load %arg6[%c0_75, %c0_76] : memref<1x32xf32, #tpu.memory_space<vmem>>, vector<1x32xf32>
    %208 = vector.broadcast %207 : vector<1x32xf32> to vector<8x32xf32>
    %209 = arith.addf %206, %208 : vector<8x32xf32>
    %210 = arith.addf %209, %10 : vector<8x32xf32>
    %c0_77 = arith.constant 0 : index
    %c0_78 = arith.constant 0 : index
    %211 = vector.load %arg7[%c0_77, %c0_78] : memref<1x32xf32, #tpu.memory_space<vmem>>, vector<1x32xf32>
    %c0_79 = arith.constant 0 : index
    %c0_80 = arith.constant 0 : index
    %212 = vector.load %arg8[%c0_79, %c0_80] : memref<1x32xf32, #tpu.memory_space<vmem>>, vector<1x32xf32>
    %cst_81 = arith.constant dense<0.000000e+00> : vector<8xf32>
    %213 = vector.multi_reduction <add>, %210, %cst_81 [1] : vector<8x32xf32> to vector<8xf32>
    %214 = vector.shape_cast %213 : vector<8xf32> to vector<8x1xf32>
    %cst_82 = arith.constant 3.200000e+01 : f32
    %215 = vector.broadcast %cst_82 : f32 to vector<8x1xf32>
    %216 = arith.divf %214, %215 : vector<8x1xf32>
    %217 = vector.broadcast %216 : vector<8x1xf32> to vector<8x32xf32>
    %218 = arith.subf %210, %217 : vector<8x32xf32>
    %219 = vector.broadcast %216 : vector<8x1xf32> to vector<8x32xf32>
    %220 = arith.subf %210, %219 : vector<8x32xf32>
    %221 = arith.mulf %218, %220 : vector<8x32xf32>
    %cst_83 = arith.constant dense<0.000000e+00> : vector<8xf32>
    %222 = vector.multi_reduction <add>, %221, %cst_83 [1] : vector<8x32xf32> to vector<8xf32>
    %223 = vector.shape_cast %222 : vector<8xf32> to vector<8x1xf32>
    %cst_84 = arith.constant 3.200000e+01 : f32
    %224 = vector.broadcast %cst_84 : f32 to vector<8x1xf32>
    %225 = arith.divf %223, %224 : vector<8x1xf32>
    %226 = vector.broadcast %216 : vector<8x1xf32> to vector<8x32xf32>
    %227 = arith.subf %210, %226 : vector<8x32xf32>
    %cst_85 = arith.constant 9.99999974E-6 : f32
    %228 = vector.broadcast %cst_85 : f32 to vector<8x1xf32>
    %229 = arith.addf %225, %228 : vector<8x1xf32>
    %230 = math.rsqrt %229 : vector<8x1xf32>
    %231 = vector.broadcast %230 : vector<8x1xf32> to vector<8x32xf32>
    %232 = arith.mulf %227, %231 : vector<8x32xf32>
    %233 = vector.broadcast %211 : vector<1x32xf32> to vector<8x32xf32>
    %234 = arith.mulf %232, %233 : vector<8x32xf32>
    %235 = vector.broadcast %212 : vector<1x32xf32> to vector<8x32xf32>
    %236 = arith.addf %234, %235 : vector<8x32xf32>
    %c0_86 = arith.constant 0 : index
    %c0_87 = arith.constant 0 : index
    %237 = vector.load %arg7[%c0_86, %c0_87] : memref<1x32xf32, #tpu.memory_space<vmem>>, vector<1x32xf32>
    %c0_88 = arith.constant 0 : index
    %c0_89 = arith.constant 0 : index
    %238 = vector.load %arg8[%c0_88, %c0_89] : memref<1x32xf32, #tpu.memory_space<vmem>>, vector<1x32xf32>
    %cst_90 = arith.constant dense<0.000000e+00> : vector<8xf32>
    %239 = vector.multi_reduction <add>, %236, %cst_90 [1] : vector<8x32xf32> to vector<8xf32>
    %240 = vector.shape_cast %239 : vector<8xf32> to vector<8x1xf32>
    %cst_91 = arith.constant 3.200000e+01 : f32
    %241 = vector.broadcast %cst_91 : f32 to vector<8x1xf32>
    %242 = arith.divf %240, %241 : vector<8x1xf32>
    %243 = vector.broadcast %242 : vector<8x1xf32> to vector<8x32xf32>
    %244 = arith.subf %236, %243 : vector<8x32xf32>
    %245 = vector.broadcast %242 : vector<8x1xf32> to vector<8x32xf32>
    %246 = arith.subf %236, %245 : vector<8x32xf32>
    %247 = arith.mulf %244, %246 : vector<8x32xf32>
    %cst_92 = arith.constant dense<0.000000e+00> : vector<8xf32>
    %248 = vector.multi_reduction <add>, %247, %cst_92 [1] : vector<8x32xf32> to vector<8xf32>
    %249 = vector.shape_cast %248 : vector<8xf32> to vector<8x1xf32>
    %cst_93 = arith.constant 3.200000e+01 : f32
    %250 = vector.broadcast %cst_93 : f32 to vector<8x1xf32>
    %251 = arith.divf %249, %250 : vector<8x1xf32>
    %252 = vector.broadcast %242 : vector<8x1xf32> to vector<8x32xf32>
    %253 = arith.subf %236, %252 : vector<8x32xf32>
    %cst_94 = arith.constant 9.99999974E-6 : f32
    %254 = vector.broadcast %cst_94 : f32 to vector<8x1xf32>
    %255 = arith.addf %251, %254 : vector<8x1xf32>
    %256 = math.rsqrt %255 : vector<8x1xf32>
    %257 = vector.broadcast %256 : vector<8x1xf32> to vector<8x32xf32>
    %258 = arith.mulf %253, %257 : vector<8x32xf32>
    %259 = vector.broadcast %237 : vector<1x32xf32> to vector<8x32xf32>
    %260 = arith.mulf %258, %259 : vector<8x32xf32>
    %261 = vector.broadcast %238 : vector<1x32xf32> to vector<8x32xf32>
    %262 = arith.addf %260, %261 : vector<8x32xf32>
    %c0_95 = arith.constant 0 : index
    %c0_96 = arith.constant 0 : index
    %263 = vector.load %arg11[%c0_95, %c0_96] : memref<32x128xf32, #tpu.memory_space<vmem>>, vector<32x128xf32>
    %cst_97 = arith.constant dense<0.000000e+00> : vector<8x128xf32>
    %264 = tpu.matmul %262, %263, %cst_97 {dimension_numbers = #tpu.dot_dimension_numbers<[1], [0], [0], [1], [0, 0, 1, 1], [], []>} : vector<8x32xf32>, vector<32x128xf32>, vector<8x128xf32> -> vector<8x128xf32>
    %c0_98 = arith.constant 0 : index
    %c0_99 = arith.constant 0 : index
    %265 = vector.load %arg12[%c0_98, %c0_99] : memref<1x128xf32, #tpu.memory_space<vmem>>, vector<1x128xf32>
    %266 = vector.broadcast %265 : vector<1x128xf32> to vector<8x128xf32>
    %267 = arith.addf %264, %266 : vector<8x128xf32>
    %cst_100 = arith.constant 0.000000e+00 : f32
    %268 = vector.broadcast %cst_100 : f32 to vector<8x128xf32>
    %269 = arith.maximumf %267, %268 : vector<8x128xf32>
    %c0_101 = arith.constant 0 : index
    %c0_102 = arith.constant 0 : index
    %270 = vector.load %arg13[%c0_101, %c0_102] : memref<128x32xf32, #tpu.memory_space<vmem>>, vector<128x32xf32>
    %cst_103 = arith.constant dense<0.000000e+00> : vector<8x32xf32>
    %271 = tpu.matmul %269, %270, %cst_103 {dimension_numbers = #tpu.dot_dimension_numbers<[1], [0], [0], [1], [0, 0, 1, 1], [], []>} : vector<8x128xf32>, vector<128x32xf32>, vector<8x32xf32> -> vector<8x32xf32>
    %c0_104 = arith.constant 0 : index
    %c0_105 = arith.constant 0 : index
    %272 = vector.load %arg14[%c0_104, %c0_105] : memref<1x32xf32, #tpu.memory_space<vmem>>, vector<1x32xf32>
    %273 = vector.broadcast %272 : vector<1x32xf32> to vector<8x32xf32>
    %274 = arith.addf %271, %273 : vector<8x32xf32>
    %275 = arith.addf %274, %262 : vector<8x32xf32>
    %c0_106 = arith.constant 0 : index
    %c0_107 = arith.constant 0 : index
    %276 = vector.load %arg9[%c0_106, %c0_107] : memref<1x32xf32, #tpu.memory_space<vmem>>, vector<1x32xf32>
    %c0_108 = arith.constant 0 : index
    %c0_109 = arith.constant 0 : index
    %277 = vector.load %arg10[%c0_108, %c0_109] : memref<1x32xf32, #tpu.memory_space<vmem>>, vector<1x32xf32>
    %cst_110 = arith.constant dense<0.000000e+00> : vector<8xf32>
    %278 = vector.multi_reduction <add>, %275, %cst_110 [1] : vector<8x32xf32> to vector<8xf32>
    %279 = vector.shape_cast %278 : vector<8xf32> to vector<8x1xf32>
    %cst_111 = arith.constant 3.200000e+01 : f32
    %280 = vector.broadcast %cst_111 : f32 to vector<8x1xf32>
    %281 = arith.divf %279, %280 : vector<8x1xf32>
    %282 = vector.broadcast %281 : vector<8x1xf32> to vector<8x32xf32>
    %283 = arith.subf %275, %282 : vector<8x32xf32>
    %284 = vector.broadcast %281 : vector<8x1xf32> to vector<8x32xf32>
    %285 = arith.subf %275, %284 : vector<8x32xf32>
    %286 = arith.mulf %283, %285 : vector<8x32xf32>
    %cst_112 = arith.constant dense<0.000000e+00> : vector<8xf32>
    %287 = vector.multi_reduction <add>, %286, %cst_112 [1] : vector<8x32xf32> to vector<8xf32>
    %288 = vector.shape_cast %287 : vector<8xf32> to vector<8x1xf32>
    %cst_113 = arith.constant 3.200000e+01 : f32
    %289 = vector.broadcast %cst_113 : f32 to vector<8x1xf32>
    %290 = arith.divf %288, %289 : vector<8x1xf32>
    %291 = vector.broadcast %281 : vector<8x1xf32> to vector<8x32xf32>
    %292 = arith.subf %275, %291 : vector<8x32xf32>
    %cst_114 = arith.constant 9.99999974E-6 : f32
    %293 = vector.broadcast %cst_114 : f32 to vector<8x1xf32>
    %294 = arith.addf %290, %293 : vector<8x1xf32>
    %295 = math.rsqrt %294 : vector<8x1xf32>
    %296 = vector.broadcast %295 : vector<8x1xf32> to vector<8x32xf32>
    %297 = arith.mulf %292, %296 : vector<8x32xf32>
    %298 = vector.broadcast %276 : vector<1x32xf32> to vector<8x32xf32>
    %299 = arith.mulf %297, %298 : vector<8x32xf32>
    %300 = vector.broadcast %277 : vector<1x32xf32> to vector<8x32xf32>
    %301 = arith.addf %299, %300 : vector<8x32xf32>
    %c0_115 = arith.constant 0 : index
    %c0_116 = arith.constant 0 : index
    %c0_117 = arith.constant 0 : index
    %302 = vector.load %arg15[%c0_115, %c0_116, %c0_117] : memref<1x8x32xf32, #tpu.memory_space<vmem>>, vector<1x8x32xf32>
    %303 = vector.shape_cast %302 : vector<1x8x32xf32> to vector<8x32xf32>
    %304 = vector.shape_cast %301 : vector<8x32xf32> to vector<1x8x32xf32>
    tpu.vector_store %arg15[%c0_115, %c0_116, %c0_117], %304 {strides = array<i32>} : memref<1x8x32xf32, #tpu.memory_space<vmem>>, vector<1x8x32xf32>,
    return
  }
  func.func @transform_0(%arg0: i32) -> (i32, i32, i32) {
    %c0_i32 = arith.constant 0 : i32
    %c0_i32_0 = arith.constant 0 : i32
    %c0_i32_1 = arith.constant 0 : i32
    return %arg0, %c0_i32, %c0_i32_0 : i32, i32, i32
  }
  func.func @transform_1(%arg0: i32) -> (i32, i32, i32) {
    %c0_i32 = arith.constant 0 : i32
    %c0_i32_0 = arith.constant 0 : i32
    %c0_i32_1 = arith.constant 0 : i32
    return %arg0, %c0_i32, %c0_i32_0 : i32, i32, i32
  }
  func.func @transform_2(%arg0: i32) -> (i32, i32) {
    %c0_i32 = arith.constant 0 : i32
    %c0_i32_0 = arith.constant 0 : i32
    %c0_i32_1 = arith.constant 0 : i32
    return %c0_i32, %c0_i32_0 : i32, i32
  }
  func.func @transform_3(%arg0: i32) -> (i32, i32) {
    %c0_i32 = arith.constant 0 : i32
    %c0_i32_0 = arith.constant 0 : i32
    %c0_i32_1 = arith.constant 0 : i32
    return %c0_i32, %c0_i32_0 : i32, i32
  }
  func.func @transform_4(%arg0: i32) -> (i32, i32) {
    %c0_i32 = arith.constant 0 : i32
    %c0_i32_0 = arith.constant 0 : i32
    %c0_i32_1 = arith.constant 0 : i32
    return %c0_i32, %c0_i32_0 : i32, i32
  }
  func.func @transform_5(%arg0: i32) -> (i32, i32) {
    %c0_i32 = arith.constant 0 : i32
    %c0_i32_0 = arith.constant 0 : i32
    %c0_i32_1 = arith.constant 0 : i32
    return %c0_i32, %c0_i32_0 : i32, i32
  }
  func.func @transform_6(%arg0: i32) -> (i32, i32) {
    %c0_i32 = arith.constant 0 : i32
    %c0_i32_0 = arith.constant 0 : i32
    %c0_i32_1 = arith.constant 0 : i32
    return %c0_i32, %c0_i32_0 : i32, i32
  }
  func.func @transform_7(%arg0: i32) -> (i32, i32) {
    %c0_i32 = arith.constant 0 : i32
    %c0_i32_0 = arith.constant 0 : i32
    %c0_i32_1 = arith.constant 0 : i32
    return %c0_i32, %c0_i32_0 : i32, i32
  }
  func.func @transform_8(%arg0: i32) -> (i32, i32) {
    %c0_i32 = arith.constant 0 : i32
    %c0_i32_0 = arith.constant 0 : i32
    %c0_i32_1 = arith.constant 0 : i32
    return %c0_i32, %c0_i32_0 : i32, i32
  }
  func.func @transform_9(%arg0: i32) -> (i32, i32) {
    %c0_i32 = arith.constant 0 : i32
    %c0_i32_0 = arith.constant 0 : i32
    %c0_i32_1 = arith.constant 0 : i32
    return %c0_i32, %c0_i32_0 : i32, i32
  }
  func.func @transform_10(%arg0: i32) -> (i32, i32) {
    %c0_i32 = arith.constant 0 : i32
    %c0_i32_0 = arith.constant 0 : i32
    %c0_i32_1 = arith.constant 0 : i32
    return %c0_i32, %c0_i32_0 : i32, i32
  }
  func.func @transform_11(%arg0: i32) -> (i32, i32) {
    %c0_i32 = arith.constant 0 : i32
    %c0_i32_0 = arith.constant 0 : i32
    %c0_i32_1 = arith.constant 0 : i32
    return %c0_i32, %c0_i32_0 : i32, i32
  }
  func.func @transform_12(%arg0: i32) -> (i32, i32) {
    %c0_i32 = arith.constant 0 : i32
    %c0_i32_0 = arith.constant 0 : i32
    %c0_i32_1 = arith.constant 0 : i32
    return %c0_i32, %c0_i32_0 : i32, i32
  }
  func.func @transform_13(%arg0: i32) -> (i32, i32) {
    %c0_i32 = arith.constant 0 : i32
    %c0_i32_0 = arith.constant 0 : i32
    %c0_i32_1 = arith.constant 0 : i32
    return %c0_i32, %c0_i32_0 : i32, i32
  }
  func.func @transform_14(%arg0: i32) -> (i32, i32, i32) {
    %c0_i32 = arith.constant 0 : i32
    %c0_i32_0 = arith.constant 0 : i32
    %c0_i32_1 = arith.constant 0 : i32
    return %arg0, %c0_i32, %c0_i32_0 : i32, i32, i32
  }
}

</mosaic_0001>

<bundles_post_ra>
// kernel: tpu_custom_call.1
= control target key start
LH: loop header
LB: loop body
LE: loop exit
PB: predicated region body
PF: predicated region fallthrough
CT: control target
= control target key end

     0   :  { %s3798_s0 = inlined_call_operand.vmem [shape: s32[2,8,1], index: 0, kind: input, shape index: {}]   ;;  %s3799_s1 = inlined_call_operand.vmem [shape: s32[2,1,8], index: 1, kind: input, shape index: {}]   ;;  %s3800_s2 = inlined_call_operand.vmem [shape: f32[16,32], index: 2, kind: input, shape index: {}]   ;;  %s3801_s3 = inlined_call_operand.vmem [shape: f32[16,32], index: 3, kind: input, shape index: {}]   ;;  %s3802_s4 = inlined_call_operand.vmem [shape: f32[32,32], index: 4, kind: input, shape index: {}]   ;;  %s3803_s5 = inlined_call_operand.vmem [shape: f32[1,32], index: 5, kind: input, shape index: {}]   ;;  %s3804_s6 = inlined_call_operand.vmem [shape: f32[1,32], index: 6, kind: input, shape index: {}]   ;;  %s3805_s7 = inlined_call_operand.vmem [shape: f32[1,32], index: 7, kind: input, shape index: {}]   ;;  %s3806_s8 = inlined_call_operand.vmem [shape: f32[1,32], index: 8, kind: input, shape index: {}]   ;;  %s3807_s9 = inlined_call_operand.vmem [shape: f32[1,32], index: 9, kind: input, shape index: {}]   ;;  %s3808_s10 = inlined_call_operand.vmem [shape: f32[32,128], index: 10, kind: input, shape index: {}]   ;;  %s3809_s11 = inlined_call_operand.vmem [shape: f32[1,128], index: 11, kind: input, shape index: {}]   ;;  %s3810_s12 = inlined_call_operand.vmem [shape: f32[128,32], index: 12, kind: input, shape index: {}]   ;;  %s3811_s13 = inlined_call_operand.vmem [shape: f32[1,32], index: 13, kind: input, shape index: {}]   ;;  %s3812_s14 = inlined_call_operand.hbm [shape: f32[2,8,32], index: 14, kind: output, shape index: {}]  }
   0x1   :  { %3813 = sst [smem:[#allocation5_spill]] %s3798_s0 }
   0x2   :  { %3814 = sst [smem:[#allocation6_spill]] %s3799_s1 }
   0x3   :  { %3815 = sst [smem:[#allocation7_spill]] %s3800_s2 }
   0x4   :  { %3816 = sst [smem:[#allocation8_spill]] %s3801_s3 }
   0x5   :  { %3817 = sst [smem:[#allocation9_spill]] %s3802_s4 }
   0x6   :  { %19 = vsyncpa [#allocation3], 0 }
   0x7   :  { %21 = vsyncpa [#allocation3 + $0x1], 0  ;;  %s3403_s29 = smov 0   ;;  %s3405_s30 = smov 0  }
   0x8   :  { %s3407_s15 = smov 0   ;;  %s3409_s16 = smov 0  }
   0x9 LB: > { %s3424_s17 = sadd.s32 4294967295, %s3314_s16   ;;  %s2824_s18 = sadd.s32 4294967294, %s3314_s16   ;;  %s3314_s16 = sphi %s3409_s16, %s3828_s16   ;;  %s3310_s15 = sphi %s3407_s15, %s3827_s15   ;;  %s3306_s30 = sphi %s3405_s30, %s3826_s30   ;;  %s3302_s29 = sphi %s3403_s29, %s3825_s29  }
   0xa   : > { %s3428_s19 = sadd.s32 1, %s3314_s16   ;;  %s338_s20 = sadd.s32 1, %s3310_s15 }
   0xb   : > { %s335_s21 = ssub.s32 %s3314_s16, %s3428_s19  ;;  %p348_p0 = scmp.ne.s32.totalorder %s3310_s15, %s3306_s30 }
   0xc   : > { %p336_p1 = scmp.eq.s32.totalorder %s335_s21, 0  ;;  %p349_p2 = scmp.eq.s32.totalorder %s3424_s17, 1 }
   0xd   : > { %p354_p3 = scmp.ne.s32.totalorder %s3306_s30, %s3302_s29  ;;  %p355_p4 = scmp.eq.s32.totalorder %s2824_s18, 1 }
   0xe   : > { %s3439_s22 = scalar_select %p336_p1, %s3310_s15, %s338_s20  }
   0xf   : > { %p3441_p5 = por %p349_p2, %p348_p0  ;;  %p3445_p6 = por %p355_p4, %p354_p3 }
  0x10   : > { %p2827_p7 = scmp.ge.s32.totalorder %s3314_s16, 1  ;;  %p422_p8 = scmp.lt.s32.totalorder %s3314_s16, 3 }
  0x12   : > { %p423_p9 = pnand %p2827_p7, %p422_p8 }
  0x13   : > { %p470_p10 = scmp.lt.s32.totalorder (!%p423_p9), %s3424_s17, 1  ;;  %v478_v0 = vlaneseq (!%p423_p9)  ;;  %s3820_s2 = sld [smem:[#allocation7_spill]] (!%p423_p9)  ;;  %v3316_v3 = vmov (!%p423_p9), 0   ;;  %v3317_v4 = vmov (!%p423_p9), 0.0|0.0   ;;  %v3318_v7 = vmov (!%p423_p9), 0.0  }
  0x14   : > { %426 = sbr.rel (%p423_p9) target bundleno = 6666 (0x1a0a), region = 76  ;;  %3213 = vset.pattern.permute.xlu0 (!%p423_p9), %v3316_v3  ;;  %3130 = vmatprep.subr.bf16.mxu1 (!%p423_p9), %v3317_v4  ;;  %s3821_s1 = sld [smem:[#allocation6_spill]] (!%p423_p9)  ;;  %vm3319_vm1 = vmmov (!%p423_p9), 0   ;;  %vm489_vm2 = vcmask (!%p423_p9), 130048   ;;  %vm568_vm4 = vcmask (!%p423_p9), 31744   ;;  %vm651_vm6 = vcmask (!%p423_p9), 64512  }
  0x15   : > { %v645_v6 = vshrl.u32 (!%p423_p9), %v478_v0, 7  ;;  %2989 = vmatprep.subr.mxu0 (!%p423_p9), %v3318_v7  ;;  %s3822_s0 = sld [smem:[#allocation5_spill]] (!%p423_p9)  ;;  %2961 = vmatprep.mubr.msk.f32.mxu1 (!%p423_p9), %vm3319_vm1, %v3318_v7  ;;  %v479_v13 = vand.u32 (!%p423_p9), 127, %v478_v0  ;;  %s3823_s3 = sld [smem:[#allocation8_spill]] (!%p423_p9)  ;;  %vm902_vm7 = vcmask (!%p423_p9), 1043456   ;;  %vm2489_vm8 = vcmask (!%p423_p9), 261120  }
  0x16   : > { %2991 = vmatprep.mubr.msk.f32.mxu0 (!%p423_p9), %vm3319_vm1, %v3318_v7  ;;  %s3320_s20 = smov (!%p423_p9), 124   ;;  %s3824_s4 = sld [smem:[#allocation9_spill]] (!%p423_p9) }
  0x17   : > { %v646_v8 = vsub.s32 (!%p423_p9), 0, %v645_v6  ;;  %s3322_s27 = smov (!%p423_p9), 116   ;;  %s467_s21 = sand.u32 (!%p423_p9), 1, %s3306_s30  }
  0x19   : > { %v486_v1 = vld [vmem:[%s3820_s2] sm:$0xff] (!%p423_p9)  ;;  %v487_v2 = vld [vmem:[%s3820_s2 + $0x8] sm:$0xff] (!%p423_p9) }
  0x1a   : > { %v3131_v5 = vpack.c.bf16 (!%p423_p9), %v487_v2, %v486_v1 }
  0x1b   : > { %s471_s18 = scalar_select %p470_p10, %s3424_s17, 1  ;;  %v488_v16 = vld [vmem:[%s3823_s3] sm:$0xff] }
  0x1c   : > { %3132 = vmatpush3.bf16.msra.mxu1 %v3131_v5  ;;  %v564_v34 = vld [vmem:[%s3824_s4] sm:$0xff]  ;;  %v565_v6 = vld [vmem:[%s3824_s4 + $0x8] sm:$0xff] }
  0x1d   : > { %s476_s25 = scalar_lea.vmem %s3821_s1, %s471_s18  ;;  %s2829_s26 = sshll.u32 %s471_s18, 3  ;;  %2964 = vmatprep.subr.mxu1 %v3318_v7  ;;  %2990 = vmatpush3.msk.msra.mxu0 %vm902_vm7, %v564_v34  ;;  %v898_v52 = vrot.slane %v564_v34, 4 }
  0x1e   : > { %v563_v9 = vld [vmem:[%s476_s25] sm:$0x1]  ;;  %s473_s2 = scalar_lea.vmem %s3822_s0, %s2829_s26  ;;  %2999 = vmatprep.subr.mxu0 %v3318_v7  ;;  %s3321_s26 = smov 120  }
  0x1f   : > { %vm642_vm0 = vcmp.eq.s32.totalorder %v563_v9, 0  ;;  %v477_v10 = vld [vmem:[%s473_s2] sm:$0xff]  ;;  %s3323_s18 = smov 112   ;;  %s2828_s25 = sshll.u32 %s467_s21, 3 }
  0x20   : > { %v643_v11 = vsel %vm642_vm0, 1, %v3316_v3  ;;  %481 = vperm.xlu0 %3213, %v477_v10   ;;  %s2881_s0 = sshll.u32 %s3424_s17, 7  ;;  %s469_s1 = scalar_lea.vmem [#allocation2], %s2828_s25 }
  0x21   : > { %v3468_v12 = vrot.slane %v643_v11, %v646_v8  ;;  %s3327_s17 = smov [#allocation2]  }
  0x22   : > { %s3256_s25 = sshll.u32 %s3327_s17, 4  ;;  %s3257_s25 = int_to_ptr.vmem [resolvable:$false] %s3256_s25 }
  0x23   : > { %vm648_vm5 = vcmp.eq.s32.totalorder %v3468_v12, 1  ;;  %s3258_s28 = scalar_lea.vmem %s3257_s25, 256 }
  0x9f   : > { %v482_v14 = vpop.permute.xlu0 %481 }
  0xa0   : > { %vm483_vm3 = vcmp.eq.s32.totalorder %v479_v13, %v482_v14  ;;  %v1449_v13 = vrot.slane %v565_v6, 4 }
  0xa1   : > { %v2830_v15 = vsel %vm483_vm3, 1.0, %v3318_v7 }
  0xa2   : > { %2962 = vmatmul.mubr.msk.f32.vlgmr.msra.gmra.mrb[0].mxu1 %vm489_vm2, %v2830_v15 }
  0xa3   : > { %2966 = vmatprep.mubr.msk.f32.mxu1 %vm3319_vm1, %v3318_v7 }
 0x175   : > { %v559_v17 = vpop.f32.mrb[0].mxu1 }
 0x176   : > { %v3480_v18 = vadd.f32 %v559_v17, %v488_v16  ;;  %v2963_v19 = vpop.f32.mrb[1].mxu1 }
 0x178   : > { %2965 = vmatpush3.xpose.msk.msra.mxu1 %vm568_vm4, %v3480_v18 }
 0x179   : > { %2969 = vmatprep.subr.mxu1 %v3318_v7 }
 0x17b   : > { %2967 = vmatmul.mubr.msk.f32.vlgmr.msra.gmra.mrb[2].mxu1 %vm568_vm4, %v3480_v18 }
 0x17c   : > { %2970 = vmatpush3.msra.mxu1 %v3480_v18  ;;  %2971 = vmatprep.mubr.msk.f32.mxu1 %vm3319_vm1, %v3318_v7 }
 0x17d   : > { %2974 = vmatprep.subr.mxu1 %v3318_v7 }
 0x24e   : > { %v638_v20 = vpop.f32.mrb[2].mxu1 }
 0x24f   : > { %v649_v21 = vsel %vm648_vm5, -1e+20, %v638_v20  ;;  %v2968_v22 = vpop.f32.mrb[3].mxu1 }
 0x250   : > { %v650_v23 = vmul.f32 0.17677669, %v649_v21 }
 0x252   : > { %v652_v24 = vsel %vm651_vm6, %v650_v23, -inf }
 0x253   : > { %653 = vmax.xlane.f32.xlu0 %v652_v24 }
 0x2e0   : > { %v654_v25 = vpop.xlane.xlu0 %653 }
 0x2e1   : > { %v655_v26 = vsub.f32 %v650_v23, %v654_v25 }
 0x2e3   : > { %v656_v27 = vmul.f32 1.442695, %v655_v26 }
 0x2e5   : > { %3214 = vpow2.f32 %v656_v27 }
 0x2ef   : > { %v3215_v28 = vpop.eup %3214 }
 0x2f0   : > { %v658_v29 = vsel %vm651_vm6, %v3215_v28, 0.0 }
 0x2f1   : > { %659 = vadd.xlane.f32.xlu1 %v658_v29 }
 0x302   : > { %736 = vrot.lane.b32.xlu1 %v3480_v18, %s3320_s20  ;;  %s3324_s20 = smov 108  }
 0x37e   : > { %v660_v30 = vpop.xlane.xlu1 %659 }
 0x37f   : > { %3216 = vrcp.f32 %v660_v30 }
 0x382   : > { %v737_v33 = vpop.permute.xlu1 %736 }
 0x389   : > { %v3217_v31 = vpop.eup %3216 }
 0x38a   : > { %v662_v32 = vmul.f32 %v3217_v31, %v3215_v28 }
 0x38c   : > { %2972 = vmatmul.mubr.msk.f32.vlgmr.msra.gmra.mrb[4].mxu1 %vm651_vm6, %v662_v32 }
 0x38d   : > { %2975 = vmatpush3.xpose.msk.msra.mxu1 %vm568_vm4, %v737_v33  ;;  %2976 = vmatprep.mubr.msk.f32.mxu1 %vm3319_vm1, %v3318_v7 }
 0x38e   : > { %2979 = vmatprep.subr.mxu1 %v3318_v7 }
 0x390   : > { %2977 = vmatmul.mubr.msk.f32.vlgmr.msra.gmra.mrb[6].mxu1 %vm568_vm4, %v737_v33 }
 0x391   : > { %2980 = vmatpush3.msra.mxu1 %v737_v33  ;;  %2981 = vmatprep.mubr.msk.f32.mxu1 %vm3319_vm1, %v3318_v7 }
 0x392   : > { %2984 = vmatprep.subr.mxu1 %v3318_v7 }
 0x45f   : > { %v732_v35 = vpop.f32.mrb[4].mxu1 }
 0x460   : > { %v2973_v36 = vpop.f32.mrb[5].mxu1  ;;  %2992 = vmatmul.mubr.msk.f32.vlgmr.msra.gmra.mrb[0].mxu0 %vm568_vm4, %v732_v35 }
 0x461   : > { %3001 = vmatprep.mubr.msk.f32.mxu0 %vm3319_vm1, %v3318_v7 }
 0x463   : > { %v806_v37 = vpop.f32.mrb[6].mxu1 }
 0x464   : > { %v810_v38 = vsel %vm648_vm5, -1e+20, %v806_v37  ;;  %v2978_v39 = vpop.f32.mrb[7].mxu1 }
 0x465   : > { %v811_v40 = vmul.f32 0.17677669, %v810_v38 }
 0x467   : > { %v812_v41 = vsel %vm651_vm6, %v811_v40, -inf }
 0x468   : > { %813 = vmax.xlane.f32.xlu1 %v812_v41 }
 0x4f5   : > { %v814_v42 = vpop.xlane.xlu1 %813 }
 0x4f6   : > { %v815_v43 = vsub.f32 %v811_v40, %v814_v42 }
 0x4f8   : > { %v816_v44 = vmul.f32 1.442695, %v815_v43 }
 0x4fa   : > { %3218 = vpow2.f32 %v816_v44 }
 0x504   : > { %v3219_v45 = vpop.eup %3218 }
 0x505   : > { %v818_v46 = vsel %vm651_vm6, %v3219_v45, 0.0 }
 0x506   : > { %819 = vadd.xlane.f32.xlu0 %v818_v46  ;;  %v566_v46 = vld [vmem:[%s3824_s4 + $0x10] sm:$0xff] }
 0x51c   : > { %1050 = vrot.lane.b32.xlu0 %v3480_v18, %s3321_s26  ;;  %s3325_s26 = smov 104  }
 0x533   : > { %v1046_v47 = vpop.f32.mrb[0].mxu0 }
 0x534   : > { %v2993_v48 = vpop.f32.mrb[1].mxu0 }
 0x593   : > { %v820_v49 = vpop.xlane.xlu0 %819 }
 0x594   : > { %3220 = vrcp.f32 %v820_v49 }
 0x597   : > { %v1051_v50 = vpop.permute.xlu0 %1050 }
 0x598   : > { %3000 = vmatpush3.msra.mxu0 %v1051_v50 }
 0x599   : > { %3009 = vmatprep.subr.mxu0 %v3318_v7 }
 0x59e   : > { %v3221_v51 = vpop.eup %3220 }
 0x59f   : > { %v822_v53 = vmul.f32 %v3221_v51, %v3219_v45 }
 0x5a1   : > { %2982 = vmatmul.mubr.msk.f32.vlgmr.msra.gmra.mrb[8].mxu1 %vm651_vm6, %v822_v53 }
 0x5a2   : > { %2985 = vmatpush3.msk.msra.mxu1 %vm902_vm7, %v898_v52  ;;  %2986 = vmatprep.mubr.msk.f32.mxu1 %vm3319_vm1, %v3318_v7 }
 0x5a3   : > { %2994 = vmatprep.subr.mxu1 %v3318_v7 }
 0x674   : > { %v893_v54 = vpop.f32.mrb[8].mxu1 }
 0x675   : > { %v2983_v55 = vpop.f32.mrb[9].mxu1  ;;  %2987 = vmatmul.mubr.msk.f32.vlgmr.msra.gmra.mrb[10].mxu1 %vm568_vm4, %v893_v54  ;;  %v1925_v54 = vrot.slane %v566_v46, 4 }
 0x676   : > { %2995 = vmatpush3.xpose.msk.msra.mxu1 %vm568_vm4, %v1051_v50  ;;  %2996 = vmatprep.mubr.msk.f32.mxu1 %vm3319_vm1, %v3318_v7 }
 0x677   : > { %3004 = vmatprep.subr.mxu1 %v3318_v7 }
 0x679   : > { %2997 = vmatmul.mubr.msk.f32.vlgmr.msra.gmra.mrb[12].mxu1 %vm568_vm4, %v1051_v50 }
 0x67a   : > { %3006 = vmatprep.mubr.msk.f32.mxu1 %vm3319_vm1, %v3318_v7  ;;  %3005 = vmatpush3.msk.msra.mxu1 %vm902_vm7, %v565_v6 }
 0x67b   : > { %3014 = vmatprep.subr.mxu1 %v3318_v7 }
 0x748   : > { %v971_v56 = vpop.f32.mrb[10].mxu1 }
 0x749   : > { %v1047_v57 = vadd.f32 %v1046_v47, %v971_v56  ;;  %v2988_v58 = vpop.f32.mrb[11].mxu1 }
 0x74c   : > { %v1120_v59 = vpop.f32.mrb[12].mxu1 }
 0x74d   : > { %v1124_v60 = vsel %vm648_vm5, -1e+20, %v1120_v59  ;;  %v2998_v61 = vpop.f32.mrb[13].mxu1 }
 0x74e   : > { %v1125_v62 = vmul.f32 0.17677669, %v1124_v60 }
 0x750   : > { %v1126_v63 = vsel %vm651_vm6, %v1125_v62, -inf }
 0x751   : > { %1127 = vmax.xlane.f32.xlu1 %v1126_v63 }
 0x762   : > { %1288 = vrot.lane.b32.xlu1 %v3480_v18, %s3322_s27  ;;  %s3326_s27 = smov 100  }
 0x7de   : > { %v1128_v0 = vpop.xlane.xlu1 %1127 }
 0x7df   : > { %v1129_v1 = vsub.f32 %v1125_v62, %v1128_v0 }
 0x7e1   : > { %v1130_v2 = vmul.f32 1.442695, %v1129_v1 }
 0x7e2   : > { %v1289_v11 = vpop.permute.xlu1 %1288 }
 0x7e3   : > { %3222 = vpow2.f32 %v1130_v2 }
 0x7ed   : > { %v3223_v3 = vpop.eup %3222 }
 0x7ee   : > { %v1132_v5 = vsel %vm651_vm6, %v3223_v3, 0.0 }
 0x7ef   : > { %1133 = vadd.xlane.f32.xlu0 %v1132_v5 }
 0x87c   : > { %v1134_v8 = vpop.xlane.xlu0 %1133 }
 0x87d   : > { %3224 = vrcp.f32 %v1134_v8 }
 0x887   : > { %v3225_v9 = vpop.eup %3224 }
 0x888   : > { %v1136_v10 = vmul.f32 %v3225_v9, %v3223_v3 }
 0x88a   : > { %3002 = vmatmul.mubr.msk.f32.vlgmr.msra.gmra.mrb[2].mxu0 %vm651_vm6, %v1136_v10 }
 0x88b   : > { %3010 = vmatpush3.xpose.msk.msra.mxu0 %vm568_vm4, %v1289_v11  ;;  %3011 = vmatprep.mubr.msk.f32.mxu0 %vm3319_vm1, %v3318_v7 }
 0x88c   : > { %3019 = vmatprep.subr.mxu0 %v3318_v7 }
 0x88e   : > { %3012 = vmatmul.mubr.msk.f32.vlgmr.msra.gmra.mrb[4].mxu0 %vm568_vm4, %v1289_v11 }
 0x88f   : > { %3020 = vmatpush3.msk.msra.mxu0 %vm902_vm7, %v1449_v13  ;;  %3021 = vmatprep.mubr.msk.f32.mxu0 %vm3319_vm1, %v3318_v7 }
 0x890   : > { %3029 = vmatprep.subr.mxu0 %v3318_v7 }
 0x95d   : > { %v1207_v14 = vpop.f32.mrb[2].mxu0 }
 0x95e   : > { %v3003_v15 = vpop.f32.mrb[3].mxu0  ;;  %3007 = vmatmul.mubr.msk.f32.vlgmr.msra.gmra.mrb[14].mxu1 %vm568_vm4, %v1207_v14 }
 0x95f   : > { %3015 = vmatpush3.msra.mxu1 %v1289_v11  ;;  %3016 = vmatprep.mubr.msk.f32.mxu1 %vm3319_vm1, %v3318_v7 }
 0x960   : > { %3024 = vmatprep.subr.mxu1 %v3318_v7 }
 0x961   : > { %v1358_v16 = vpop.f32.mrb[4].mxu0 }
 0x962   : > { %v1362_v17 = vsel %vm648_vm5, -1e+20, %v1358_v16  ;;  %v3013_v19 = vpop.f32.mrb[5].mxu0 }
 0x963   : > { %v1363_v20 = vmul.f32 0.17677669, %v1362_v17 }
 0x965   : > { %v1364_v21 = vsel %vm651_vm6, %v1363_v20, -inf }
 0x966   : > { %1365 = vmax.xlane.f32.xlu1 %v1364_v21 }
 0x9f3   : > { %v1366_v22 = vpop.xlane.xlu1 %1365 }
 0x9f4   : > { %v1367_v23 = vsub.f32 %v1363_v20, %v1366_v22 }
 0x9f6   : > { %v1368_v24 = vmul.f32 1.442695, %v1367_v23 }
 0x9f8   : > { %3226 = vpow2.f32 %v1368_v24 }
 0xa02   : > { %v3227_v25 = vpop.eup %3226 }
 0xa03   : > { %v1370_v26 = vsel %vm651_vm6, %v3227_v25, 0.0 }
 0xa04   : > { %1371 = vadd.xlane.f32.xlu0 %v1370_v26  ;;  %v567_v26 = vld [vmem:[%s3824_s4 + $0x18] sm:$0xff]  ;;  %s3755_s4 = scalar_lea.hbm %s3812_s14, %s2881_s0 }
 0xa1a   : > { %1526 = vrot.lane.b32.xlu0 %v3480_v18, %s3323_s18  ;;  %s2756_s18 = sshll.u32 %s469_s1, 4  ;;  %s3757_s18 = int_to_ptr.vmem [resolvable:$true] %s2756_s18 }
 0xa1b   : > { %p3259_p0 = scmp.lt.s32.totalorder %s3757_s18, %s3257_s25 }
 0xa31   : > { %v1283_v27 = vpop.f32.mrb[14].mxu1 }
 0xa32   : > { %v1287_v28 = vadd.f32 %v1283_v27, %v1047_v57  ;;  %v3008_v29 = vpop.f32.mrb[15].mxu1 }
 0xa91   : > { %v1372_v30 = vpop.xlane.xlu0 %1371 }
 0xa92   : > { %3228 = vrcp.f32 %v1372_v30 }
 0xa95   : > { %v1527_v33 = vpop.permute.xlu0 %1526 }
 0xa9c   : > { %v3229_v31 = vpop.eup %3228 }
 0xa9d   : > { %v1374_v32 = vmul.f32 %v3229_v31, %v3227_v25 }
 0xa9f   : > { %3017 = vmatmul.mubr.msk.f32.vlgmr.msra.gmra.mrb[16].mxu1 %vm651_vm6, %v1374_v32 }
 0xaa0   : > { %3025 = vmatpush3.xpose.msk.msra.mxu1 %vm568_vm4, %v1527_v33  ;;  %3026 = vmatprep.mubr.msk.f32.mxu1 %vm3319_vm1, %v3318_v7 }
 0xaa1   : > { %3034 = vmatprep.subr.mxu1 %v3318_v7 }
 0xaa3   : > { %3027 = vmatmul.mubr.msk.f32.vlgmr.msra.gmra.mrb[18].mxu1 %vm568_vm4, %v1527_v33 }
 0xaa4   : > { %3036 = vmatprep.mubr.msk.f32.mxu1 %vm3319_vm1, %v3318_v7  ;;  %3035 = vmatpush3.msk.msra.mxu1 %vm902_vm7, %v566_v46 }
 0xaa5   : > { %3044 = vmatprep.subr.mxu1 %v3318_v7 }
 0xb72   : > { %v1445_v34 = vpop.f32.mrb[16].mxu1 }
 0xb73   : > { %v3018_v35 = vpop.f32.mrb[17].mxu1  ;;  %3022 = vmatmul.mubr.msk.f32.vlgmr.msra.gmra.mrb[6].mxu0 %vm568_vm4, %v1445_v34  ;;  %v2401_v34 = vrot.slane %v567_v26, 4 }
 0xb74   : > { %3030 = vmatpush3.msra.mxu0 %v1527_v33  ;;  %3031 = vmatprep.mubr.msk.f32.mxu0 %vm3319_vm1, %v3318_v7 }
 0xb75   : > { %3039 = vmatprep.subr.mxu0 %v3318_v7 }
 0xb76   : > { %v1596_v36 = vpop.f32.mrb[18].mxu1 }
 0xb77   : > { %v1600_v37 = vsel %vm648_vm5, -1e+20, %v1596_v36  ;;  %v3028_v38 = vpop.f32.mrb[19].mxu1 }
 0xb78   : > { %v1601_v39 = vmul.f32 0.17677669, %v1600_v37 }
 0xb7a   : > { %v1602_v40 = vsel %vm651_vm6, %v1601_v39, -inf }
 0xb7b   : > { %1603 = vmax.xlane.f32.xlu1 %v1602_v40 }
 0xb8c   : > { %1764 = vrot.lane.b32.xlu1 %v3480_v18, %s3324_s20 }
 0xc08   : > { %v1604_v41 = vpop.xlane.xlu1 %1603 }
 0xc09   : > { %v1605_v42 = vsub.f32 %v1601_v39, %v1604_v41 }
 0xc0b   : > { %v1606_v43 = vmul.f32 1.442695, %v1605_v42 }
 0xc0c   : > { %v1765_v53 = vpop.permute.xlu1 %1764 }
 0xc0d   : > { %3230 = vpow2.f32 %v1606_v43 }
 0xc17   : > { %v3231_v44 = vpop.eup %3230 }
 0xc18   : > { %v1608_v45 = vsel %vm651_vm6, %v3231_v44, 0.0 }
 0xc19   : > { %1609 = vadd.xlane.f32.xlu0 %v1608_v45 }
 0xc46   : > { %v1521_v47 = vpop.f32.mrb[6].mxu0 }
 0xc47   : > { %v1525_v48 = vadd.f32 %v1521_v47, %v1287_v28  ;;  %v3023_v49 = vpop.f32.mrb[7].mxu0 }
 0xca6   : > { %v1610_v50 = vpop.xlane.xlu0 %1609 }
 0xca7   : > { %3232 = vrcp.f32 %v1610_v50 }
 0xcb1   : > { %v3233_v51 = vpop.eup %3232 }
 0xcb2   : > { %v1612_v52 = vmul.f32 %v3233_v51, %v3231_v44 }
 0xcb4   : > { %3032 = vmatmul.mubr.msk.f32.vlgmr.msra.gmra.mrb[8].mxu0 %vm651_vm6, %v1612_v52 }
 0xcb5   : > { %3040 = vmatpush3.xpose.msk.msra.mxu0 %vm568_vm4, %v1765_v53  ;;  %3041 = vmatprep.mubr.msk.f32.mxu0 %vm3319_vm1, %v3318_v7 }
 0xcb6   : > { %3049 = vmatprep.subr.mxu0 %v3318_v7 }
 0xcb8   : > { %3042 = vmatmul.mubr.msk.f32.vlgmr.msra.gmra.mrb[10].mxu0 %vm568_vm4, %v1765_v53 }
 0xcb9   : > { %3050 = vmatpush3.msk.msra.mxu0 %vm902_vm7, %v1925_v54  ;;  %3051 = vmatprep.mubr.msk.f32.mxu0 %vm3319_vm1, %v3318_v7 }
 0xcba   : > { %3059 = vmatprep.subr.mxu0 %v3318_v7 }
 0xd87   : > { %v1683_v55 = vpop.f32.mrb[8].mxu0 }
 0xd88   : > { %v3033_v56 = vpop.f32.mrb[9].mxu0  ;;  %3037 = vmatmul.mubr.msk.f32.vlgmr.msra.gmra.mrb[20].mxu1 %vm568_vm4, %v1683_v55  ;;  %v2872_v55 = vld [vmem:[%s3803_s5] ss:$0 sm:$0xff] }
 0xd89   : > { %3045 = vmatpush3.msra.mxu1 %v1765_v53  ;;  %3046 = vmatprep.mubr.msk.f32.mxu1 %vm3319_vm1, %v3318_v7 }
 0xd8a   : > { %3054 = vmatprep.subr.mxu1 %v3318_v7 }
 0xd8b   : > { %v1834_v57 = vpop.f32.mrb[10].mxu0 }
 0xd8c   : > { %v1838_v58 = vsel %vm648_vm5, -1e+20, %v1834_v57  ;;  %v3043_v59 = vpop.f32.mrb[11].mxu0 }
 0xd8d   : > { %v1839_v60 = vmul.f32 0.17677669, %v1838_v58 }
 0xd8f   : > { %v1840_v61 = vsel %vm651_vm6, %v1839_v60, -inf }
 0xd90   : > { %1841 = vmax.xlane.f32.xlu1 %v1840_v61 }
 0xe1d   : > { %v1842_v62 = vpop.xlane.xlu1 %1841 }
 0xe1e   : > { %v1843_v63 = vsub.f32 %v1839_v60, %v1842_v62 }
 0xe20   : > { %v1844_v0 = vmul.f32 1.442695, %v1843_v63 }
 0xe22   : > { %3234 = vpow2.f32 %v1844_v0 }
 0xe2c   : > { %v3235_v1 = vpop.eup %3234 }
 0xe2d   : > { %v1846_v2 = vsel %vm651_vm6, %v3235_v1, 0.0 }
 0xe2e   : > { %1847 = vadd.xlane.f32.xlu0 %v1846_v2 }
 0xe44   : > { %2002 = vrot.lane.b32.xlu0 %v3480_v18, %s3325_s26  ;;  %s2743_s26 = scalar_lea.sflag [#allocation3], %s467_s21 }
 0xe5b   : > { %v1759_v3 = vpop.f32.mrb[20].mxu1 }
 0xe5c   : > { %v1763_v5 = vadd.f32 %v1759_v3, %v1525_v48  ;;  %v3038_v6 = vpop.f32.mrb[21].mxu1 }
 0xe5d   : > { %v3658_v6 = vld [vmem:[%s3804_s6] ss:$0 sm:$0xff] }
 0xebb   : > { %v1848_v8 = vpop.xlane.xlu0 %1847 }
 0xebc   : > { %3236 = vrcp.f32 %v1848_v8  ;;  %v2874_v8 = vld [vmem:[%s3805_s7] ss:$0 sm:$0xff] }
 0xebf   : > { %v2003_v11 = vpop.permute.xlu0 %2002 }
 0xec6   : > { %v3237_v9 = vpop.eup %3236 }
 0xec7   : > { %v1850_v10 = vmul.f32 %v3237_v9, %v3235_v1 }
 0xec9   : > { %3047 = vmatmul.mubr.msk.f32.vlgmr.msra.gmra.mrb[22].mxu1 %vm651_vm6, %v1850_v10 }
 0xeca   : > { %3055 = vmatpush3.xpose.msk.msra.mxu1 %vm568_vm4, %v2003_v11  ;;  %3056 = vmatprep.mubr.msk.f32.mxu1 %vm3319_vm1, %v3318_v7 }
 0xecb   : > { %3064 = vmatprep.subr.mxu1 %v3318_v7 }
 0xecd   : > { %3057 = vmatmul.mubr.msk.f32.vlgmr.msra.gmra.mrb[24].mxu1 %vm568_vm4, %v2003_v11 }
 0xece   : > { %3066 = vmatprep.mubr.msk.f32.mxu1 %vm3319_vm1, %v3318_v7  ;;  %3065 = vmatpush3.msk.msra.mxu1 %vm902_vm7, %v567_v26  ;;  %v2619_v26 = vld [vmem:[%s3810_s12 + $0x8] sm:$0xff] }
 0xecf   : > { %3074 = vmatprep.subr.mxu1 %v3318_v7 }
 0xf9c   : > { %v1921_v13 = vpop.f32.mrb[22].mxu1 }
 0xf9d   : > { %v3048_v14 = vpop.f32.mrb[23].mxu1  ;;  %3052 = vmatmul.mubr.msk.f32.vlgmr.msra.gmra.mrb[12].mxu0 %vm568_vm4, %v1921_v13 }
 0xf9e   : > { %3060 = vmatpush3.msra.mxu0 %v2003_v11  ;;  %3061 = vmatprep.mubr.msk.f32.mxu0 %vm3319_vm1, %v3318_v7 }
 0xf9f   : > { %3069 = vmatprep.subr.mxu0 %v3318_v7 }
 0xfa0   : > { %v2072_v15 = vpop.f32.mrb[24].mxu1 }
 0xfa1   : > { %v2076_v16 = vsel %vm648_vm5, -1e+20, %v2072_v15  ;;  %v3058_v17 = vpop.f32.mrb[25].mxu1 }
 0xfa2   : > { %v2077_v19 = vmul.f32 0.17677669, %v2076_v16 }
 0xfa4   : > { %v2078_v20 = vsel %vm651_vm6, %v2077_v19, -inf }
 0xfa5   : > { %2079 = vmax.xlane.f32.xlu1 %v2078_v20  ;;  %v2534_v20 = vld [vmem:[%s3808_s10 + $0x8] sm:$0xff] }
 0xfb6   : > { %2240 = vrot.lane.b32.xlu1 %v3480_v18, %s3326_s27  ;;  %s3252_s27 = scalar_lea.vmem %s3757_s18, 128 }
 0xfb7   : > { %p3253_p11 = scmp.ne.s32.totalorder %s3757_s18, %s3252_s27  ;;  %p3260_p1 = scmp.lt.s32.totalorder %s3258_s28, %s3252_s27 }
 0xfb9   : > { %p3254_p12 = pnand %p3253_p11, %p3441_p5  ;;  %p3261_p2 = por %p3260_p1, %p3259_p0 }
 0xfbb   : > { %p3255_p13 = pneg %p3254_p12 }
 0xfbd   : > { %p3262_p3 = pnand %p3261_p2, %p3255_p13 }
0x1032   : > { %v2080_v21 = vpop.xlane.xlu1 %2079 }
0x1033   : > { %v2081_v22 = vsub.f32 %v2077_v19, %v2080_v21  ;;  %v2533_v19 = vld [vmem:[%s3808_s10] sm:$0xff] }
0x1034   : > { %v3134_v21 = vpack.c.bf16 %v2534_v20, %v2533_v19 }
0x1035   : > { %v2082_v23 = vmul.f32 1.442695, %v2081_v22  ;;  %v2535_v22 = vld [vmem:[%s3808_s10 + $0x10] sm:$0xff] }
0x1036   : > { %v2241_v33 = vpop.permute.xlu1 %2240 }
0x1037   : > { %3238 = vpow2.f32 %v2082_v23  ;;  %v2536_v23 = vld [vmem:[%s3808_s10 + $0x18] sm:$0xff] }
0x1041   : > { %v3239_v24 = vpop.eup %3238 }
0x1042   : > { %v2084_v25 = vsel %vm651_vm6, %v3239_v24, 0.0 }
0x1043   : > { %2085 = vadd.xlane.f32.xlu0 %v2084_v25  ;;  %v2618_v25 = vld [vmem:[%s3810_s12] sm:$0xff] }
0x1070   : > { %v1997_v27 = vpop.f32.mrb[12].mxu0 }
0x1071   : > { %v2001_v28 = vadd.f32 %v1997_v27, %v1763_v5  ;;  %v3053_v29 = vpop.f32.mrb[13].mxu0  ;;  %v2620_v27 = vld [vmem:[%s3810_s12 + $0x10] sm:$0xff] }
0x1072   : > { %v2621_v29 = vld [vmem:[%s3810_s12 + $0x18] sm:$0xff] }
0x10d0   : > { %v2086_v30 = vpop.xlane.xlu0 %2085 }
0x10d1   : > { %3240 = vrcp.f32 %v2086_v30  ;;  %v3143_v30 = vpack.c.bf16 %v2621_v29, %v2620_v27 }
0x10db   : > { %v3241_v31 = vpop.eup %3240 }
0x10dc   : > { %v2088_v32 = vmul.f32 %v3241_v31, %v3239_v24  ;;  %v3137_v24 = vpack.c.bf16 %v2536_v23, %v2535_v22  ;;  %v2622_v31 = vld [vmem:[%s3810_s12 + $0x20] sm:$0xff] }
0x10de   : > { %3062 = vmatmul.mubr.msk.f32.vlgmr.msra.gmra.mrb[14].mxu0 %vm651_vm6, %v2088_v32  ;;  %v2623_v32 = vld [vmem:[%s3810_s12 + $0x28] sm:$0xff] }
0x10df   : > { %3070 = vmatpush3.xpose.msk.msra.mxu0 %vm568_vm4, %v2241_v33  ;;  %3071 = vmatprep.mubr.msk.f32.mxu0 %vm3319_vm1, %v3318_v7 }
0x10e0   : > { %3079 = vmatprep.subr.mxu0 %v3318_v7 }
0x10e2   : > { %3072 = vmatmul.mubr.msk.f32.vlgmr.msra.gmra.mrb[16].mxu0 %vm568_vm4, %v2241_v33 }
0x10e3   : > { %3080 = vmatpush3.msk.msra.mxu0 %vm902_vm7, %v2401_v34  ;;  %3081 = vmatprep.mubr.msk.f32.mxu0 %vm3319_vm1, %v3318_v7  ;;  %v2624_v34 = vld [vmem:[%s3810_s12 + $0x30] sm:$0xff] }
0x10e4   : > { %3139 = vmatprep.subr.bf16.mxu0 %v3317_v4 }
0x11b1   : > { %v2159_v35 = vpop.f32.mrb[14].mxu0 }
0x11b2   : > { %v3063_v36 = vpop.f32.mrb[15].mxu0  ;;  %3067 = vmatmul.mubr.msk.f32.vlgmr.msra.gmra.mrb[26].mxu1 %vm568_vm4, %v2159_v35  ;;  %v2625_v35 = vld [vmem:[%s3810_s12 + $0x38] sm:$0xff] }
0x11b3   : > { %3075 = vmatpush3.msra.mxu1 %v2241_v33  ;;  %3076 = vmatprep.mubr.msk.f32.mxu1 %vm3319_vm1, %v3318_v7  ;;  %v3146_v33 = vpack.c.bf16 %v2623_v32, %v2622_v31  ;;  %v3149_v36 = vpack.c.bf16 %v2625_v35, %v2624_v34 }
0x11b4   : > { %3133 = vmatprep.subr.bf16.mxu1 %v3317_v4 }
0x11b5   : > { %v2310_v37 = vpop.f32.mrb[16].mxu0 }
0x11b6   : > { %v2314_v38 = vsel %vm648_vm5, -1e+20, %v2310_v37  ;;  %v3073_v39 = vpop.f32.mrb[17].mxu0  ;;  %v2626_v37 = vld [vmem:[%s3810_s12 + $0x40] sm:$0xff] }
0x11b7   : > { %v2315_v40 = vmul.f32 0.17677669, %v2314_v38  ;;  %v2627_v38 = vld [vmem:[%s3810_s12 + $0x48] sm:$0xff] }
0x11b8   : > { %v3152_v39 = vpack.c.bf16 %v2627_v38, %v2626_v37 }
0x11b9   : > { %v2316_v41 = vsel %vm651_vm6, %v2315_v40, -inf }
0x11ba   : > { %2317 = vmax.xlane.f32.xlu1 %v2316_v41  ;;  %v2629_v41 = vld [vmem:[%s3810_s12 + $0x58] sm:$0xff] }
0x1247   : > { %v2318_v42 = vpop.xlane.xlu1 %2317 }
0x1248   : > { %v2319_v43 = vsub.f32 %v2315_v40, %v2318_v42  ;;  %v2628_v40 = vld [vmem:[%s3810_s12 + $0x50] sm:$0xff] }
0x1249   : > { %v3155_v42 = vpack.c.bf16 %v2629_v41, %v2628_v40 }
0x124a   : > { %v2320_v44 = vmul.f32 1.442695, %v2319_v43  ;;  %v2630_v43 = vld [vmem:[%s3810_s12 + $0x60] sm:$0xff] }
0x124c   : > { %3242 = vpow2.f32 %v2320_v44  ;;  %v2631_v44 = vld [vmem:[%s3810_s12 + $0x68] sm:$0xff] }
0x1256   : > { %v3243_v45 = vpop.eup %3242 }
0x1257   : > { %v2322_v46 = vsel %vm651_vm6, %v3243_v45, 0.0 }
0x1258   : > { %2323 = vadd.xlane.f32.xlu0 %v2322_v46 }
0x1285   : > { %v2235_v47 = vpop.f32.mrb[26].mxu1 }
0x1286   : > { %v2239_v48 = vadd.f32 %v2235_v47, %v2001_v28  ;;  %v3068_v49 = vpop.f32.mrb[27].mxu1  ;;  %v3140_v28 = vpack.c.bf16 %v2619_v26, %v2618_v25 }
0x12e5   : > { %v2324_v50 = vpop.xlane.xlu0 %2323 }
0x12e6   : > { %3244 = vrcp.f32 %v2324_v50 }
0x12f0   : > { %v3245_v12 = vpop.eup %3244 }
0x12f1   : > { %v2326_v51 = vmul.f32 %v3245_v12, %v3243_v45  ;;  %v3158_v45 = vpack.c.bf16 %v2631_v44, %v2630_v43 }
0x12f3   : > { %3077 = vmatmul.mubr.msk.f32.vlgmr.msra.gmra.mrb[28].mxu1 %vm651_vm6, %v2326_v51 }
0x12f4   : > { %3092 = vmatprep.mubr.msk.f32.mxu1 %vm3319_vm1, %v3318_v7  ;;  %3135 = vmatpush3.bf16.msra.mxu1 %v3134_v21 }
0x12f5   : > { %3136 = vmatprep.subr.bf16.mxu1 %v3317_v4 }
0x12f8   : > { %3138 = vmatpush3.bf16.msra.mxu1 %v3137_v24 }
0x13c6   : > { %v2397_v52 = vpop.f32.mrb[28].mxu1 }
0x13c7   : > { %v3078_v53 = vpop.f32.mrb[29].mxu1  ;;  %3082 = vmatmul.mubr.msk.f32.vlgmr.msra.gmra.mrb[18].mxu0 %vm568_vm4, %v2397_v52  ;;  %v2632_v52 = vld [vmem:[%s3810_s12 + $0x70] sm:$0xff] }
0x13c8   : > { %3127 = vmatprep.mubr.msk.f32.mxu0 %vm3319_vm1, %v3318_v7  ;;  %3141 = vmatpush3.bf16.msra.mxu0 %v3140_v28  ;;  %v2633_v53 = vld [vmem:[%s3810_s12 + $0x78] sm:$0xff] }
0x13c9   : > { %3142 = vmatprep.subr.bf16.mxu0 %v3317_v4 }
0x13cc   : > { %3144 = vmatpush3.bf16.msra.mxu0 %v3143_v30 }
0x13cd   : > { %3145 = vmatprep.subr.bf16.mxu0 %v3317_v4 }
0x13d0   : > { %3147 = vmatpush3.bf16.msra.mxu0 %v3146_v33 }
0x13d1   : > { %3148 = vmatprep.subr.bf16.mxu0 %v3317_v4 }
0x13d4   : > { %3150 = vmatpush3.bf16.msra.mxu0 %v3149_v36 }
0x13d5   : > { %3151 = vmatprep.subr.bf16.mxu0 %v3317_v4 }
0x13d8   : > { %3153 = vmatpush3.bf16.msra.mxu0 %v3152_v39 }
0x13d9   : > { %3154 = vmatprep.subr.bf16.mxu0 %v3317_v4 }
0x13dc   : > { %3156 = vmatpush3.bf16.msra.mxu0 %v3155_v42 }
0x13dd   : > { %3157 = vmatprep.subr.bf16.mxu0 %v3317_v4 }
0x13e0   : > { %3159 = vmatpush3.bf16.msra.mxu0 %v3158_v45 }
0x13e1   : > { %3160 = vmatprep.subr.bf16.mxu0 %v3317_v4  ;;  %v3161_v4 = vpack.c.bf16 %v2633_v53, %v2632_v52 }
0x13e4   : > { %3162 = vmatpush3.bf16.msra.mxu0 %v3161_v4 }
0x149a   : > { %v2473_v54 = vpop.f32.mrb[18].mxu0 }
0x149b   : > { %v2477_v56 = vadd.f32 %v2473_v54, %v2239_v48  ;;  %v3083_v57 = vpop.f32.mrb[19].mxu0  ;;  %v2875_v54 = vld [vmem:[%s3809_s11] ss:$0 sm:$0xff] }
0x149d   : > { %v2485_v58 = vadd.f32 %v2872_v55, %v2477_v56 }
0x149f   : > { %v2486_v59 = vadd.f32 %v2485_v58, %v3480_v18 }
0x14a1   : > { %v2490_v60 = vsel %vm2489_vm8, %v2486_v59, 0.0 }
0x14a2   : > { %2491 = vadd.xlane.f32.xlu0 %v2490_v60 }
0x152f   : > { %v2492_v61 = vpop.xlane.xlu0 %2491 }
0x1530   : > { %v2494_v62 = vmul.f32 0.03125, %v2492_v61 }
0x1532   : > { %v2495_v63 = vsub.f32 %v2486_v59, %v2494_v62  ;;  %v2877_v59 = vld [vmem:[%s3811_s13] ss:$0 sm:$0xff] }
0x1534   : > { %v2496_v0 = vmul.f32 %v2495_v63, %v2495_v63 }
0x1536   : > { %v2497_v7 = vsel %vm2489_vm8, %v2496_v0, 0.0 }
0x1537   : > { %2498 = vadd.xlane.f32.xlu0 %v2497_v7 }
0x15c4   : > { %v2499_v1 = vpop.xlane.xlu0 %2498 }
0x15c5   : > { %v2500_v2 = vmul.f32 0.03125, %v2499_v1 }
0x15c7   : > { %v2501_v3 = vadd.f32 1e-05, %v2500_v2 }
0x15c9   : > { %3246 = vrsqrt.f32 %v2501_v3 }
0x15d3   : > { %v3247_v5 = vpop.eup %3246 }
0x15d4   : > { %v2503_v18 = vmul.f32 %v3247_v5, %v2495_v63 }
0x15d6   : > { %v2510_v9 = vmul.f32 %v3658_v6, %v2503_v18 }
0x15d8   : > { %v2517_v10 = vadd.f32 %v2874_v8, %v2510_v9 }
0x15da   : > { %v2518_v11 = vsel %vm2489_vm8, %v2517_v10, 0.0 }
0x15db   : > { %2519 = vadd.xlane.f32.xlu0 %v2518_v11 }
0x1668   : > { %v2520_v13 = vpop.xlane.xlu0 %2519 }
0x1669   : > { %v2521_v14 = vmul.f32 0.03125, %v2520_v13  ;;  %v2879_v13 = vld [vmem:[%s3807_s9] ss:$0 sm:$0xff] }
0x166b   : > { %v2522_v15 = vsub.f32 %v2517_v10, %v2521_v14  ;;  %v2878_v10 = vld [vmem:[%s3806_s8] ss:$0 sm:$0xff] }
0x166d   : > { %v2523_v16 = vmul.f32 %v2522_v15, %v2522_v15 }
0x166f   : > { %v2524_v17 = vsel %vm2489_vm8, %v2523_v16, 0.0 }
0x1670   : > { %2525 = vadd.xlane.f32.xlu0 %v2524_v17 }
0x16fd   : > { %v2526_v46 = vpop.xlane.xlu0 %2525 }
0x16fe   : > { %v2527_v47 = vmul.f32 0.03125, %v2526_v46 }
0x1700   : > { %v2528_v48 = vadd.f32 1e-05, %v2527_v47 }
0x1702   : > { %3248 = vrsqrt.f32 %v2528_v48 }
0x170c   : > { %v3249_v49 = vpop.eup %3248 }
0x170d   : > { %v2530_v50 = vmul.f32 %v3249_v49, %v2522_v15 }
0x170f   : > { %v2531_v12 = vmul.f32 %v3658_v6, %v2530_v50 }
0x1711   : > { %v2532_v51 = vadd.f32 %v2874_v8, %v2531_v12 }
0x1713   : > { %3093 = vmatmul.mubr.msk.f32.vlgmr.msra.gmra.mrb[30].mxu1 %vm2489_vm8, %v2532_v51 }
0x17e6   : > { %v2613_v55 = vpop.f32.mrb[30].mxu1 }
0x17e7   : > { %v2614_v56 = vadd.f32 %v2875_v54, %v2613_v55  ;;  %v3094_v57 = vpop.f32.mrb[31].mxu1 }
0x17e9   : > { %v2617_v58 = vmax.f32 %v2614_v56, 0.0 }
0x17eb   : > { %3128 = vmatmul.mubr.f32.vlgmr.msra.gmra.mrb[20].mxu0 %v2617_v58 }
0x18be   : > { %v2707_v60 = vpop.f32.mrb[20].mxu0 }
0x18bf   : > { %v2708_v61 = vadd.f32 %v2877_v59, %v2707_v60  ;;  %v3129_v62 = vpop.f32.mrb[21].mxu0 }
0x18c1   : > { %v2711_v63 = vadd.f32 %v2708_v61, %v2532_v51 }
0x18c3   : > { %v2714_v0 = vsel %vm2489_vm8, %v2711_v63, 0.0 }
0x18c4   : > { %2715 = vadd.xlane.f32.xlu0 %v2714_v0 }
0x1951   : > { %v2716_v7 = vpop.xlane.xlu0 %2715 }
0x1952   : > { %v2717_v1 = vmul.f32 0.03125, %v2716_v7 }
0x1954   : > { %v2718_v2 = vsub.f32 %v2711_v63, %v2717_v1 }
0x1956   : > { %v2719_v3 = vmul.f32 %v2718_v2, %v2718_v2 }
0x1958   : > { %v2720_v5 = vsel %vm2489_vm8, %v2719_v3, 0.0 }
0x1959   : > { %2721 = vadd.xlane.f32.xlu1 %v2720_v5 }
0x19e6   : > { %v2722_v6 = vpop.xlane.xlu1 %2721 }
0x19e7   : > { %v2723_v18 = vmul.f32 0.03125, %v2722_v6 }
0x19e9   : > { %v2724_v8 = vadd.f32 1e-05, %v2723_v18 }
0x19eb   : > { %3250 = vrsqrt.f32 %v2724_v8 }
0x19f5   : > { %v3251_v9 = vpop.eup %3250 }
0x19f6   : > { %v2726_v11 = vmul.f32 %v3251_v9, %v2718_v2 }
0x19f8   : > { %v2733_v14 = vmul.f32 %v2878_v10, %v2726_v11 }
0x19fa   : > { %v2740_v15 = vadd.f32 %v2879_v13, %v2733_v14 }
0x19fc   : > { %2741 = vst.msk [vmem:[%s469_s1] sm:$0xff] %vm2489_vm8, %v2740_v15 }
0x19fd   : > { %3265 = shalt.err (!%p3262_p3)
}
0x19fe   : > { %s3266_s3 = scalar_lea.hbm %s3755_s4, 128  ;;  %s3270_s0 = scalar_lea.hbm %s3812_s14, 256 }
0x19ff   : > { %p3267_p4 = scmp.ne.s32.totalorder %s3755_s4, %s3266_s3  ;;  %p3271_p9 = scmp.lt.u32.totalorder %s3755_s4, %s3812_s14 }
0x1a00   : > { %p3272_p10 = scmp.lt.u32.totalorder %s3270_s0, %s3266_s3  ;;  %p3274_p12 = scmp.lt.u32.totalorder %s3266_s3, %s3755_s4 }
0x1a01   : > { %p3268_p7 = pnand %p3267_p4, %p3441_p5 }
0x1a02   : > { %p3273_p11 = por %p3272_p10, %p3271_p9 }
0x1a03   : > { %p3269_p8 = pneg %p3268_p7 }
0x1a04   : > { %p3275_p13 = por %p3274_p12, %p3273_p11 }
0x1a06   : > { %p3276_p0 = pnand %p3275_p13, %p3269_p8 }
0x1a08   : > { %3279 = shalt.err (!%p3276_p0)
}
0x1a09   : > { %3163 = dma.vmem_to_hbm [thread:$0]  (%p3441_p5), %s3757_s18, 128, %s3755_s4, %s2743_s26  }
0x1a0a PF: > { %p3169_p1 = scmp.ge.s32.totalorder %s3314_s16, 2  ;;  %s2768_s27 = sand.u32 1, %s3302_s29  }
0x1a0b   : > { %s2769_s17 = scalar_lea.sflag [#allocation3], %s2768_s27 }
0x1a0c   : > { %p3166_p2 = pnand %p3169_p1, %p3445_p6 }
0x1a0e   : > { %3297 = dma.done.wait (!%p3166_p2), %s2769_s17, 128  }
0x1a0f   : > { %3299 = vsyncadd (!%p3166_p2), %s2769_s17, 4294967168  ;;  %p24_p3 = scmp.ge.s32.totalorder %s3428_s19, 4   ;;  %s3825_s29 = smov %s3306_s30 }
0x1a10   : > { %s3826_s30 = smov %s3310_s15  ;;  %s3827_s15 = smov %s3439_s22 }
0x1a11   : > { %s3828_s16 = smov %s3428_s19  ;;  %26 = sbr.rel (!%p24_p3) target bundleno = 9 (0x9), region = 114 }
0x1a18   :  { %2774 = vsyncpa [#allocation3], 1 }
0x1a19   :  { %2776 = vsyncpa [#allocation3 + $0x1], 1 }

</bundles_post_ra>
